<compile_context>
chip_gen: v6e
topology: v6e:2x2x1
jax: 0.10.0
libtpu: 0.0.40
codegen_flags: <defaults>
</compile_context>

<pallas_src>
import jax
import jax.numpy as jnp
from jax import lax
from jax.experimental import pallas as pl
from jax.experimental.pallas import tpu as pltpu

NUM_CLASSES = 5      # nn.Parameter(torch.randn(5))
HEAD_PAD = 128       # lane-dense padded head width


def _round_up(x, m):
    return (x + m - 1) // m * m


def mm_classifier_opt2(speech, length, text, attention_mask,
                       w_speech, w_text, alpha, *,
                       time_tile=None, act_tile_bytes=8 * 1024 * 1024):
    """alpha * speech_head(speech, length) + (1-alpha) * text_head(text, mask)."""
    B, Ts, D = speech.shape
    Bt, Tt, Dt = text.shape
    assert Bt == B and Dt == D
    C = alpha.shape[0]
    assert C <= HEAD_PAD
    itemsize = max(jnp.dtype(speech.dtype).itemsize,
                   jnp.dtype(text.dtype).itemsize)

    # ---- VMEM budget (v5e/v6e: 128 MiB physical -> 96 MiB; v7x: 64 -> 48) ----
    try:
        phys_vmem = int(pltpu.get_tpu_info().vmem_capacity_bytes)
    except Exception:
        phys_vmem = 64 * 1024 * 1024          # conservative (v7x) fallback
    vmem_limit = max(32 * 1024 * 1024,
                     min(96 * 1024 * 1024, (phys_vmem * 3) // 4))
    budget = (vmem_limit * 3) // 4            # headroom for compiler scratch

    # ---- batch tiling: >= 2 blocks on the parallel axis when B >= 2 ---------
    tb = 1 if B < 2 else min(8, _round_up(B, 2) // 2)

    def pick_tt(T, tb_):
        full = _round_up(T, 8)
        if time_tile is not None:
            cap = time_tile
        else:
            cap = max(8, act_tile_bytes // max(1, tb_ * D * itemsize))
        if full <= cap:
            return full                        # untiled: block == padded extent
        return max(128, (cap // 128) * 128)    # tiled: lane/sublane aligned

    def footprint(tb_, tts, ttt):
        act = 2 * tb_ * D * itemsize * (tts + ttt)   # 2x double-buffered streams
        msk = 2 * tb_ * ttt * itemsize               # text mask stream
        heads = 2 * 2 * D * HEAD_PAD * 4             # resident head weights
        outb = 2 * tb_ * HEAD_PAD * 4
        scr = 2 * tb_ * D * 4                        # f32 accumulators
        return act + msk + heads + outb + scr

    while True:
        tt_s = pick_tt(Ts, tb)
        tt_t = pick_tt(Tt, tb)
        if tb == 1 or footprint(tb, tt_s, tt_t) <= budget:
            break
        tb = max(1, tb // 2)                   # shrink batch tile, keep tile depth

    bp = _round_up(B, tb)
    tp_s = _round_up(Ts, tt_s)
    tp_t = _round_up(Tt, tt_t)
    n_blk_s = tp_s // tt_s
    n_blk_t = tp_t // tt_t
    nt = max(n_blk_s, n_blk_t)

    # ---- glue / padding (activations stay in their native dtype) ------------
    def pad_to(x, shape):
        pads = [(0, s - d) for s, d in zip(shape, x.shape)]
        return jnp.pad(x, pads) if any(p for _, p in pads) else x

    speech_p = pad_to(speech, (bp, tp_s, D))
    text_p = pad_to(text, (bp, tp_t, D))
    lens_p = pad_to(jnp.asarray(length, jnp.int32).reshape(B, 1, 1), (bp, 1, 1))
    am = jnp.asarray(attention_mask)
    # precomputed text valid-token count (replaces per-step denominator accum)
    tcnt_p = pad_to(am.astype(jnp.float32).sum(axis=-1).reshape(B, 1, 1), (bp, 1, 1))
    # NOTE: mask cast to the activation dtype; exact for 0/1 masks.
    tmask_p = pad_to(am.astype(text.dtype).reshape(B, 1, Tt), (bp, 1, tp_t))

    # Fold alpha into the (tiny, static) head weights; pad 5 -> 128 lanes.
    a = alpha.astype(jnp.float32)
    ws_eff = jnp.zeros((D, HEAD_PAD), jnp.float32).at[:, :C].set(
        w_speech.astype(jnp.float32) * a[None, :])
    wt_eff = jnp.zeros((D, HEAD_PAD), jnp.float32).at[:, :C].set(
        w_text.astype(jnp.float32) * (1.0 - a)[None, :])

    # ---- kernel (closes over static tiling constants) -----------------------
    def kernel(lens_ref, tcnt_ref, tmask_ref, speech_ref, text_ref,
               ws_ref, wt_ref, out_ref, s_acc, t_acc):
        t = pl.program_id(1)

        @pl.when(t == 0)
        def _init():
            s_acc[...] = jnp.zeros_like(s_acc)
            t_acc[...] = jnp.zeros_like(t_acc)

        def _accum_speech():
            speech = speech_ref[...]                               # (tb, tt_s, D)
            tbk, tts, _ = speech.shape
            col = lax.broadcasted_iota(jnp.int32, (tbk, 1, tts), 2) + t * tts
            smask = (col < lens_ref[...]).astype(speech.dtype)     # (tb, 1, tt_s)
            s_acc[...] += jnp.einsum('bqt,btd->bqd', smask, speech,
                                     preferred_element_type=jnp.float32)

        def _accum_text():
            t_acc[...] += jnp.einsum('bqt,btd->bqd',
                                     tmask_ref[...], text_ref[...],
                                     preferred_element_type=jnp.float32)

        # Gate the shorter modality; its clamped index_map keeps the DMA elided.
        if n_blk_s < nt:
            pl.when(t < n_blk_s)(_accum_speech)
        else:
            _accum_speech()
        if n_blk_t < nt:
            pl.when(t < n_blk_t)(_accum_text)
        else:
            _accum_text()

        @pl.when(t == nt - 1)
        def _finalize():
            tbk, _, dk = s_acc.shape
            # max(count, 1): rows with zero valid frames/tokens yield 0 logits
            # (the PyTorch reference would produce NaN via 0/0 - documented).
            s_cnt = jnp.maximum(jnp.minimum(lens_ref[...], Ts), 1).astype(jnp.float32)
            t_cnt = jnp.maximum(tcnt_ref[...], 1.0)
            s_pooled = (s_acc[...] / s_cnt).reshape(tbk, dk)
            t_pooled = (t_acc[...] / t_cnt).reshape(tbk, dk)
            logits = (jnp.dot(s_pooled, ws_ref[...],
                              preferred_element_type=jnp.float32)
                      + jnp.dot(t_pooled, wt_ref[...],
                                preferred_element_type=jnp.float32))
            out_ref[...] = logits[:, None, :].astype(out_ref.dtype)

    grid = (bp // tb, nt)
    out = pl.pallas_call(
        kernel,
        out_shape=jax.ShapeDtypeStruct((bp, 1, HEAD_PAD), jnp.float32),
        grid_spec=pltpu.PrefetchScalarGridSpec(
            num_scalar_prefetch=0,
            grid=grid,
            in_specs=[
                pl.BlockSpec((tb, 1, 1), lambda b, t: (b, 0, 0)),      # lengths
                pl.BlockSpec((tb, 1, 1), lambda b, t: (b, 0, 0)),      # text counts
                pl.BlockSpec((tb, 1, tt_t),                            # text mask
                             lambda b, t, n=n_blk_t: (b, 0, jnp.minimum(t, n - 1))),
                pl.BlockSpec((tb, tt_s, D),                            # speech
                             lambda b, t, n=n_blk_s: (b, jnp.minimum(t, n - 1), 0)),
                pl.BlockSpec((tb, tt_t, D),                            # text
                             lambda b, t, n=n_blk_t: (b, jnp.minimum(t, n - 1), 0)),
                pl.BlockSpec((D, HEAD_PAD), lambda b, t: (0, 0)),      # speech head
                pl.BlockSpec((D, HEAD_PAD), lambda b, t: (0, 0)),      # text head
            ],
            out_specs=pl.BlockSpec((tb, 1, HEAD_PAD), lambda b, t: (b, 0, 0)),
            scratch_shapes=[
                pltpu.VMEM((tb, 1, D), jnp.float32),   # speech masked-sum acc
                pltpu.VMEM((tb, 1, D), jnp.float32),   # text masked-sum acc
            ],
        ),
        compiler_params=pltpu.CompilerParams(
            dimension_semantics=("parallel", "arbitrary"),
            vmem_limit_bytes=int(vmem_limit),
        ),
    )(lens_p, tcnt_p, tmask_p, speech_p, text_p, ws_eff, wt_eff)

    return out[:B, 0, :C]


def _reference(speech, length, text, attention_mask, w_speech, w_text, alpha):
    sp = speech.astype(jnp.float32)
    tx = text.astype(jnp.float32)
    Ts = sp.shape[1]
    smask = (jnp.arange(Ts)[None, :] < length[:, None]).astype(jnp.float32)
    tmask = attention_mask.astype(jnp.float32)
    s_pooled = (sp * smask[:, :, None]).sum(1) / smask.sum(1, keepdims=True)
    t_pooled = (tx * tmask[:, :, None]).sum(1) / tmask.sum(1, keepdims=True)
    s_logits = s_pooled @ w_speech.astype(jnp.float32)
    t_logits = t_pooled @ w_text.astype(jnp.float32)
    a = alpha.astype(jnp.float32)
    return a[None, :] * s_logits + (1.0 - a)[None, :] * t_logits


if __name__ == "__main__":
    # Small but realistic shapes: wav2vec2 frame count > BERT token count, and
    # the real encoder hidden size (768) so the lane dim is dense.
    B, Ts, Tt, D = 2, 296, 120, 768

    key = jax.random.PRNGKey(0)
    k_sp, k_tx, k_ws, k_wt, k_a = jax.random.split(key, 5)

    # Encoder activations in bf16 (native inference dtype): the kernel DMAs
    # them as-is and accumulates in f32 on the MXU.
    speech = jax.random.normal(k_sp, (B, Ts, D), jnp.float32).astype(jnp.bfloat16)
    text = jax.random.normal(k_tx, (B, Tt, D), jnp.float32).astype(jnp.bfloat16)
    length = jnp.array([Ts, 173], dtype=jnp.int32)                  # valid speech frames
    attention_mask = (jnp.arange(Tt)[None, :]
                      < jnp.array([[Tt], [75]])).astype(jnp.int32)  # valid text tokens

    w_speech = jax.random.normal(k_ws, (D, NUM_CLASSES), jnp.float32) * 0.05
    w_text = jax.random.normal(k_wt, (D, NUM_CLASSES), jnp.float32) * 0.05
    alpha = jax.random.normal(k_a, (NUM_CLASSES,), jnp.float32)     # torch.randn(5)

    # time_tile=128 forces a multi-block speech reduction (296 -> 3 blocks) while
    # text fits in a single elided block -> exercises the clamped index_map +
    # pl.when gating path, the scratch accumulators and tail padding.
    out = mm_classifier_opt2(speech, length, text, attention_mask,
                             w_speech, w_text, alpha, time_tile=128)
    out = jax.block_until_ready(out)

    ref = _reference(speech, length, text, attention_mask, w_speech, w_text, alpha)
    assert out.shape == (B, NUM_CLASSES)
    # both sides see identical bf16 inputs and accumulate in f32; only
    # summation-order differences remain.
    assert jnp.allclose(out, ref, atol=2e-3, rtol=2e-3), (out, ref)

    print("KERNEL_OK")
</pallas_src>

<mosaic_0001>
module attributes {stable_mosaic.version = 11 : i64} {
  func.func @kernel(%arg0: i32, %arg1: i32, %arg2: memref<1x1x1xi32, #tpu.memory_space<vmem>>, %arg3: memref<1x1x1xf32, #tpu.memory_space<vmem>>, %arg4: memref<1x1x120xbf16, #tpu.memory_space<vmem>>, %arg5: memref<1x128x768xbf16, #tpu.memory_space<vmem>>, %arg6: memref<1x120x768xbf16, #tpu.memory_space<vmem>>, %arg7: memref<768x128xf32, #tpu.memory_space<vmem>>, %arg8: memref<768x128xf32, #tpu.memory_space<vmem>>, %arg9: memref<1x1x128xf32, #tpu.memory_space<vmem>>, %arg10: memref<1x1x768xf32, #tpu.memory_space<vmem>>, %arg11: memref<1x1x768xf32, #tpu.memory_space<vmem>>) attributes {dimension_semantics = [#tpu.dimension_semantics<parallel>, #tpu.dimension_semantics<arbitrary>], iteration_bounds = array<i64: 2, 3>, scalar_prefetch = 0 : i64, scratch_operands = 2 : i64, tpu.core_type = #tpu.core_type<tc>, window_params = [{transform_indices = @transform_0, window_bounds = array<i64: 1, 1, 1>}, {transform_indices = @transform_1, window_bounds = array<i64: 1, 1, 1>}, {transform_indices = @transform_2, window_bounds = array<i64: 1, 1, 120>}, {transform_indices = @transform_3, window_bounds = array<i64: 1, 128, 768>}, {transform_indices = @transform_4, window_bounds = array<i64: 1, 120, 768>}, {pipeline_mode = #tpu.pipeline_mode<synchronous>, transform_indices = @transform_5, window_bounds = array<i64: 768, 128>}, {pipeline_mode = #tpu.pipeline_mode<synchronous>, transform_indices = @transform_6, window_bounds = array<i64: 768, 128>}, {transform_indices = @transform_7, window_bounds = array<i64: 1, 1, 128>}]} {
    %c0_i32 = arith.constant 0 : i32
    %0 = arith.cmpi eq, %arg1, %c0_i32 : i32
    %1 = arith.extui %0 : i1 to i32
    %c0_i32_0 = arith.constant 0 : i32
    %2 = arith.cmpi ne, %1, %c0_i32_0 : i32
    scf.if %2 {
      %cst_14 = arith.constant 0.000000e+00 : f32
      %24 = vector.broadcast %cst_14 : f32 to vector<1x1x768xf32>
      %c0_15 = arith.constant 0 : index
      %c0_16 = arith.constant 0 : index
      %c0_17 = arith.constant 0 : index
      %25 = vector.load %arg10[%c0_15, %c0_16, %c0_17] : memref<1x1x768xf32, #tpu.memory_space<vmem>>, vector<1x1x768xf32>
      tpu.vector_store %arg10[%c0_15, %c0_16, %c0_17], %24 {strides = array<i32>} : memref<1x1x768xf32, #tpu.memory_space<vmem>>, vector<1x1x768xf32>,
      %cst_18 = arith.constant 0.000000e+00 : f32
      %26 = vector.broadcast %cst_18 : f32 to vector<1x1x768xf32>
      %c0_19 = arith.constant 0 : index
      %c0_20 = arith.constant 0 : index
      %c0_21 = arith.constant 0 : index
      %27 = vector.load %arg11[%c0_19, %c0_20, %c0_21] : memref<1x1x768xf32, #tpu.memory_space<vmem>>, vector<1x1x768xf32>
      tpu.vector_store %arg11[%c0_19, %c0_20, %c0_21], %26 {strides = array<i32>} : memref<1x1x768xf32, #tpu.memory_space<vmem>>, vector<1x1x768xf32>,
    } else {
    }
    %c0 = arith.constant 0 : index
    %c0_1 = arith.constant 0 : index
    %c0_2 = arith.constant 0 : index
    %3 = vector.load %arg5[%c0, %c0_1, %c0_2] : memref<1x128x768xbf16, #tpu.memory_space<vmem>>, vector<1x128x768xbf16>
    %4 = tpu.iota {dimensions = array<i32: 2>} : vector<1x1x128xi32>
    %c128_i32 = arith.constant 128 : i32
    %5 = arith.muli %arg1, %c128_i32 : i32
    %6 = vector.broadcast %5 : i32 to vector<1x1x128xi32>
    %7 = arith.addi %4, %6 : vector<1x1x128xi32>
    %c0_3 = arith.constant 0 : index
    %c0_4 = arith.constant 0 : index
    %c0_5 = arith.constant 0 : index
    %8 = vector.load %arg2[%c0_3, %c0_4, %c0_5] : memref<1x1x1xi32, #tpu.memory_space<vmem>>, vector<1x1x1xi32>
    %9 = vector.broadcast %8 : vector<1x1x1xi32> to vector<1x1x128xi32>
    %10 = arith.cmpi slt, %7, %9 : vector<1x1x128xi32>
    %11 = arith.extui %10 : vector<1x1x128xi1> to vector<1x1x128xi32>
    %12 = arith.sitofp %11 : vector<1x1x128xi32> to vector<1x1x128xf32>
    %13 = arith.truncf %12 : vector<1x1x128xf32> to vector<1x1x128xbf16>
    %c0_6 = arith.constant 0 : index
    %c0_7 = arith.constant 0 : index
    %c0_8 = arith.constant 0 : index
    %14 = vector.load %arg10[%c0_6, %c0_7, %c0_8] : memref<1x1x768xf32, #tpu.memory_space<vmem>>, vector<1x1x768xf32>
    "tpu.trace_start"() <{level = 10 : i32, message = "bqt,btd->bqd"}> : () -> ()
    %cst = arith.constant dense<0.000000e+00> : vector<1x1x768xf32>
    %15 = tpu.matmul %13, %3, %cst {dimension_numbers = #tpu.dot_dimension_numbers<[2], [1], [1], [2], [0, 0, 0, 1, 1, 2], [0], [0]>} : vector<1x1x128xbf16>, vector<1x128x768xbf16>, vector<1x1x768xf32> -> vector<1x1x768xf32>
    "tpu.trace_stop"() : () -> ()
    %16 = arith.addf %14, %15 : vector<1x1x768xf32>
    %c0_9 = arith.constant 0 : index
    %c0_10 = arith.constant 0 : index
    %c0_11 = arith.constant 0 : index
    %17 = vector.load %arg10[%c0_9, %c0_10, %c0_11] : memref<1x1x768xf32, #tpu.memory_space<vmem>>, vector<1x1x768xf32>
    tpu.vector_store %arg10[%c0_9, %c0_10, %c0_11], %16 {strides = array<i32>} : memref<1x1x768xf32, #tpu.memory_space<vmem>>, vector<1x1x768xf32>,
    %c1_i32 = arith.constant 1 : i32
    %18 = arith.cmpi slt, %arg1, %c1_i32 : i32
    %19 = arith.extui %18 : i1 to i32
    %c0_i32_12 = arith.constant 0 : i32
    %20 = arith.cmpi ne, %19, %c0_i32_12 : i32
    scf.if %20 {
      %c0_14 = arith.constant 0 : index
      %c0_15 = arith.constant 0 : index
      %c0_16 = arith.constant 0 : index
      %24 = vector.load %arg11[%c0_14, %c0_15, %c0_16] : memref<1x1x768xf32, #tpu.memory_space<vmem>>, vector<1x1x768xf32>
      %c0_17 = arith.constant 0 : index
      %c0_18 = arith.constant 0 : index
      %c0_19 = arith.constant 0 : index
      %25 = vector.load %arg4[%c0_17, %c0_18, %c0_19] : memref<1x1x120xbf16, #tpu.memory_space<vmem>>, vector<1x1x120xbf16>
      %c0_20 = arith.constant 0 : index
      %c0_21 = arith.constant 0 : index
      %c0_22 = arith.constant 0 : index
      %26 = vector.load %arg6[%c0_20, %c0_21, %c0_22] : memref<1x120x768xbf16, #tpu.memory_space<vmem>>, vector<1x120x768xbf16>
      "tpu.trace_start"() <{level = 10 : i32, message = "bqt,btd->bqd"}> : () -> ()
      %cst_23 = arith.constant dense<0.000000e+00> : vector<1x1x768xf32>
      %27 = tpu.matmul %25, %26, %cst_23 {dimension_numbers = #tpu.dot_dimension_numbers<[2], [1], [1], [2], [0, 0, 0, 1, 1, 2], [0], [0]>} : vector<1x1x120xbf16>, vector<1x120x768xbf16>, vector<1x1x768xf32> -> vector<1x1x768xf32>
      "tpu.trace_stop"() : () -> ()
      %28 = arith.addf %24, %27 : vector<1x1x768xf32>
      %c0_24 = arith.constant 0 : index
      %c0_25 = arith.constant 0 : index
      %c0_26 = arith.constant 0 : index
      %29 = vector.load %arg11[%c0_24, %c0_25, %c0_26] : memref<1x1x768xf32, #tpu.memory_space<vmem>>, vector<1x1x768xf32>
      tpu.vector_store %arg11[%c0_24, %c0_25, %c0_26], %28 {strides = array<i32>} : memref<1x1x768xf32, #tpu.memory_space<vmem>>, vector<1x1x768xf32>,
    } else {
    }
    %c2_i32 = arith.constant 2 : i32
    %21 = arith.cmpi eq, %arg1, %c2_i32 : i32
    %22 = arith.extui %21 : i1 to i32
    %c0_i32_13 = arith.constant 0 : i32
    %23 = arith.cmpi ne, %22, %c0_i32_13 : i32
    scf.if %23 {
      %c0_14 = arith.constant 0 : index
      %c0_15 = arith.constant 0 : index
      %c0_16 = arith.constant 0 : index
      %24 = vector.load %arg2[%c0_14, %c0_15, %c0_16] : memref<1x1x1xi32, #tpu.memory_space<vmem>>, vector<1x1x1xi32>
      %c296_i32 = arith.constant 296 : i32
      %25 = vector.broadcast %c296_i32 : i32 to vector<1x1x1xi32>
      %26 = arith.minsi %24, %25 : vector<1x1x1xi32>
      %c1_i32_17 = arith.constant 1 : i32
      %27 = vector.broadcast %c1_i32_17 : i32 to vector<1x1x1xi32>
      %28 = arith.maxsi %26, %27 : vector<1x1x1xi32>
      %29 = arith.sitofp %28 : vector<1x1x1xi32> to vector<1x1x1xf32>
      %c0_18 = arith.constant 0 : index
      %c0_19 = arith.constant 0 : index
      %c0_20 = arith.constant 0 : index
      %30 = vector.load %arg3[%c0_18, %c0_19, %c0_20] : memref<1x1x1xf32, #tpu.memory_space<vmem>>, vector<1x1x1xf32>
      %cst_21 = arith.constant 1.000000e+00 : f32
      %31 = vector.broadcast %cst_21 : f32 to vector<1x1x1xf32>
      %32 = arith.maximumf %30, %31 : vector<1x1x1xf32>
      %c0_22 = arith.constant 0 : index
      %c0_23 = arith.constant 0 : index
      %c0_24 = arith.constant 0 : index
      %33 = vector.load %arg10[%c0_22, %c0_23, %c0_24] : memref<1x1x768xf32, #tpu.memory_space<vmem>>, vector<1x1x768xf32>
      %34 = vector.broadcast %29 : vector<1x1x1xf32> to vector<1x1x768xf32>
      %35 = arith.divf %33, %34 : vector<1x1x768xf32>
      %36 = vector.shape_cast %35 : vector<1x1x768xf32> to vector<1x768xf32>
      %c0_25 = arith.constant 0 : index
      %c0_26 = arith.constant 0 : index
      %c0_27 = arith.constant 0 : index
      %37 = vector.load %arg11[%c0_25, %c0_26, %c0_27] : memref<1x1x768xf32, #tpu.memory_space<vmem>>, vector<1x1x768xf32>
      %38 = vector.broadcast %32 : vector<1x1x1xf32> to vector<1x1x768xf32>
      %39 = arith.divf %37, %38 : vector<1x1x768xf32>
      %40 = vector.shape_cast %39 : vector<1x1x768xf32> to vector<1x768xf32>
      %c0_28 = arith.constant 0 : index
      %c0_29 = arith.constant 0 : index
      %41 = vector.load %arg7[%c0_28, %c0_29] : memref<768x128xf32, #tpu.memory_space<vmem>>, vector<768x128xf32>
      %cst_30 = arith.constant dense<0.000000e+00> : vector<1x128xf32>
      %42 = tpu.matmul %36, %41, %cst_30 {dimension_numbers = #tpu.dot_dimension_numbers<[1], [0], [0], [1], [0, 0, 1, 1], [], []>} : vector<1x768xf32>, vector<768x128xf32>, vector<1x128xf32> -> vector<1x128xf32>
      %c0_31 = arith.constant 0 : index
      %c0_32 = arith.constant 0 : index
      %43 = vector.load %arg8[%c0_31, %c0_32] : memref<768x128xf32, #tpu.memory_space<vmem>>, vector<768x128xf32>
      %cst_33 = arith.constant dense<0.000000e+00> : vector<1x128xf32>
      %44 = tpu.matmul %40, %43, %cst_33 {dimension_numbers = #tpu.dot_dimension_numbers<[1], [0], [0], [1], [0, 0, 1, 1], [], []>} : vector<1x768xf32>, vector<768x128xf32>, vector<1x128xf32> -> vector<1x128xf32>
      %45 = arith.addf %42, %44 : vector<1x128xf32>
      %46 = vector.shape_cast %45 : vector<1x128xf32> to vector<1x1x128xf32>
      %c0_34 = arith.constant 0 : index
      %c0_35 = arith.constant 0 : index
      %c0_36 = arith.constant 0 : index
      %47 = vector.load %arg9[%c0_34, %c0_35, %c0_36] : memref<1x1x128xf32, #tpu.memory_space<vmem>>, vector<1x1x128xf32>
      tpu.vector_store %arg9[%c0_34, %c0_35, %c0_36], %46 {strides = array<i32>} : memref<1x1x128xf32, #tpu.memory_space<vmem>>, vector<1x1x128xf32>,
    } else {
    }
    return
  }
  func.func @transform_0(%arg0: i32, %arg1: i32) -> (i32, i32, i32) {
    %c0_i32 = arith.constant 0 : i32
    %c0_i32_0 = arith.constant 0 : i32
    %c0_i32_1 = arith.constant 0 : i32
    return %arg0, %c0_i32, %c0_i32_0 : i32, i32, i32
  }
  func.func @transform_1(%arg0: i32, %arg1: i32) -> (i32, i32, i32) {
    %c0_i32 = arith.constant 0 : i32
    %c0_i32_0 = arith.constant 0 : i32
    %c0_i32_1 = arith.constant 0 : i32
    return %arg0, %c0_i32, %c0_i32_0 : i32, i32, i32
  }
  func.func @transform_2(%arg0: i32, %arg1: i32) -> (i32, i32, i32) {
    %c0_i32 = arith.constant 0 : i32
    %0 = arith.minsi %arg1, %c0_i32 : i32
    %c0_i32_0 = arith.constant 0 : i32
    %c0_i32_1 = arith.constant 0 : i32
    return %arg0, %c0_i32_0, %0 : i32, i32, i32
  }
  func.func @transform_3(%arg0: i32, %arg1: i32) -> (i32, i32, i32) {
    %c2_i32 = arith.constant 2 : i32
    %0 = arith.minsi %arg1, %c2_i32 : i32
    %c0_i32 = arith.constant 0 : i32
    %c0_i32_0 = arith.constant 0 : i32
    return %arg0, %0, %c0_i32 : i32, i32, i32
  }
  func.func @transform_4(%arg0: i32, %arg1: i32) -> (i32, i32, i32) {
    %c0_i32 = arith.constant 0 : i32
    %0 = arith.minsi %arg1, %c0_i32 : i32
    %c0_i32_0 = arith.constant 0 : i32
    %c0_i32_1 = arith.constant 0 : i32
    return %arg0, %0, %c0_i32_0 : i32, i32, i32
  }
  func.func @transform_5(%arg0: i32, %arg1: i32) -> (i32, i32) {
    %c0_i32 = arith.constant 0 : i32
    %c0_i32_0 = arith.constant 0 : i32
    %c0_i32_1 = arith.constant 0 : i32
    return %c0_i32, %c0_i32_0 : i32, i32
  }
  func.func @transform_6(%arg0: i32, %arg1: i32) -> (i32, i32) {
    %c0_i32 = arith.constant 0 : i32
    %c0_i32_0 = arith.constant 0 : i32
    %c0_i32_1 = arith.constant 0 : i32
    return %c0_i32, %c0_i32_0 : i32, i32
  }
  func.func @transform_7(%arg0: i32, %arg1: i32) -> (i32, i32, i32) {
    %c0_i32 = arith.constant 0 : i32
    %c0_i32_0 = arith.constant 0 : i32
    %c0_i32_1 = arith.constant 0 : i32
    return %arg0, %c0_i32, %c0_i32_0 : i32, i32, i32
  }
}

</mosaic_0001>

<bundles_post_ra>
// kernel: tpu_custom_call.1
= control target key start
LH: loop header
LB: loop body
LE: loop exit
PB: predicated region body
PF: predicated region fallthrough
CT: control target
= control target key end

     0   :  { %s3844_s0 = inlined_call_operand.vmem [shape: s32[2,1,1], index: 0, kind: input, shape index: {}]   ;;  %s3845_s1 = inlined_call_operand.vmem [shape: f32[2,1,1], index: 1, kind: input, shape index: {}]   ;;  %s3846_s2 = inlined_call_operand.vmem [shape: bf16[2,1,120], index: 2, kind: input, shape index: {}]   ;;  %s3847_s3 = inlined_call_operand.hbm [shape: bf16[2,384,768], index: 3, kind: input, shape index: {}]   ;;  %s3848_s4 = inlined_call_operand.hbm [shape: bf16[2,120,768], index: 4, kind: input, shape index: {}]   ;;  %s3849_s5 = inlined_call_operand.hbm [shape: f32[768,128], index: 5, kind: input, shape index: {}]   ;;  %s3850_s6 = inlined_call_operand.hbm [shape: f32[768,128], index: 6, kind: input, shape index: {}]   ;;  %s3851_s7 = inlined_call_operand.hbm [shape: f32[2,1,128], index: 7, kind: output, shape index: {}]  }
   0x1   :  { %3867 = sst [smem:[#allocation29_spill]] %s3844_s0 }
   0x2   :  { %3868 = sst [smem:[#allocation30_spill]] %s3845_s1 }
   0x3   :  { %3869 = sst [smem:[#allocation31_spill]] %s3846_s2 }
   0x4   :  { %3870 = sst [smem:[#allocation32_spill]] %s3849_s5 }
   0x5   :  { %3871 = sst [smem:[#allocation33_spill]] %s3850_s6 }
   0x6   :  { %3872 = sst [smem:[#allocation34_spill]] %s3851_s7 }
   0x7   :  { %12 = vsyncpa [#allocation5], 0 }
   0x8   :  { %14 = vsyncpa [#allocation5 + $0x1], 0 }
   0x9   :  { %15 = vsyncpa [#allocation8], 0 }
   0xa   :  { %17 = vsyncpa [#allocation8 + $0x1], 0 }
   0xb   :  { %18 = vsyncpa [#allocation11], 0 }
   0xc   :  { %19 = vsyncpa [#allocation6], 0 }
   0xd   :  { %21 = vsyncpa [#allocation6 + $0x1], 0  ;;  %s3297_s24 = smov 0   ;;  %s3299_s25 = smov 0  }
   0xe   :  { %s3301_s26 = smov 0   ;;  %s3303_s27 = smov 0  }
   0xf   :  { %s3305_s28 = smov 0   ;;  %s3307_s29 = smov 0  }
  0x10   :  { %s3309_s30 = smov 0   ;;  %s3311_s8 = smov 0  }
  0x11   :  { %s3313_s9 = smov 0   ;;  %s3315_s10 = smov 0  }
  0x12   :  { %s3317_s11 = smov 0   ;;  %s3319_s12 = smov 0  }
  0x13   :  { %s3321_s13 = smov 0   ;;  %s3323_s14 = smov 0  }
  0x14 LB: > { %3873 = sst [smem:[#allocation18_spill]] %s3188_s24  ;;  %s3364_s15 = sadd.s32 4294967295, %s3240_s14   ;;  %s3240_s14 = sphi %s3323_s14, %s27_s14   ;;  %s3236_s13 = sphi %s3321_s13, %s3936_s13   ;;  %s3232_s12 = sphi %s3319_s12, %s3924_s12   ;;  %s3228_s11 = sphi %s3317_s11, %s3935_s11   ;;  %s3224_s10 = sphi %s3315_s10, %s3934_s10   ;;  %s3220_s9 = sphi %s3313_s9, %s3922_s9   ;;  %s3216_s8 = sphi %s3311_s8, %s3933_s8   ;;  %s3212_s30 = sphi %s3309_s30, %s3932_s30   ;;  %s3208_s29 = sphi %s3307_s29, %s3931_s29   ;;  %s3204_s28 = sphi %s3305_s28, %s3930_s28   ;;  %s3200_s27 = sphi %s3303_s27, %s3929_s27   ;;  %s3196_s26 = sphi %s3301_s26, %s3928_s26   ;;  %s3192_s25 = sphi %s3299_s25, %s3927_s25   ;;  %s3188_s24 = sphi %s3297_s24, %s3926_s24  }
  0x15   : > { %3874 = sst [smem:[#allocation19_spill]] %s3220_s9  ;;  %s2316_s16 = sadd.s32 4294967294, %s3240_s14  }
  0x16   : > { %3875 = sst [smem:[#allocation20_spill]] %s3224_s10  ;;  %p149_p0 = scmp.ne.s32.totalorder %s3216_s8, %s3212_s30 }
  0x17   : > { %3876 = sst [smem:[#allocation21_spill]] %s3228_s11  ;;  %p3857_p1 = scmp.eq.s32.totalorder %s3364_s15, 0 }
  0x18   : > { %3877 = sst [smem:[#allocation22_spill]] %s3232_s12  ;;  %p181_p2 = scmp.ne.s32.totalorder %s3204_s28, %s3200_s27 }
  0x19   : > { %p3373_p3 = por %p3857_p1, %p149_p0  ;;  %p246_p4 = scmp.ne.s32.totalorder %s3196_s26, %s3192_s25 }
  0x1a   : > { %p3381_p5 = por %p181_p2, %p3857_p1  ;;  %p247_p6 = scmp.eq.s32.totalorder %s3364_s15, 5 }
  0x1b   : > { %p252_p7 = scmp.ne.s32.totalorder %s3192_s25, %s3188_s24  ;;  %p253_p8 = scmp.eq.s32.totalorder %s2316_s16, 5 }
  0x1c   : > { %s3879_s19 = scalar_select %p3381_p5, 1, 0 }
  0x1d   : > { %p3388_p9 = por %p247_p6, %p246_p4  ;;  %p2317_p10 = scmp.ge.s32.totalorder %s3240_s14, 1 }
  0x1e   : > { %p3393_p11 = por %p253_p8, %p252_p7  ;;  %p260_p12 = scmp.lt.s32.totalorder %s3240_s14, 7 }
  0x1f   : > { %s3880_s20 = scalar_select %p3388_p9, 1, 0 }
  0x20   : > { %s3882_s21 = scalar_select %p3393_p11, 1, 0 }
  0x21   : > { %3881 = sst [smem:[#allocation23_spill]] %s3880_s20  ;;  %p3398_p13 = pnand %p2317_p10, %p260_p12 }
  0x22   : > { %3883 = sst [smem:[#allocation24_spill]] %s3882_s21  ;;  %s3242_s23 = smov [#allocation9]  }
  0x23   : > { %s272_s27 = sshll.u32 %s3242_s23, 4  ;;  %p2679_p0 = pneg %p3398_p13  ;;  %s273_s27 = int_to_ptr.vmem [resolvable:$true] %s272_s27 }
  0x24   : > { %s3243_s16 = smov [#allocation10]   ;;  %s2986_s21 = scalar_lea.vmem %s273_s27, 12288 }
  0x25   : > { %p3406_p2 = pnand %p2679_p0, %p3857_p1  ;;  %s285_s17 = sshll.u32 %s3243_s16, 4  ;;  %s286_s17 = int_to_ptr.vmem [resolvable:$true] %s285_s17 }
  0x26   : > { %p2987_p6 = scmp.ne.s32.totalorder %s273_s27, %s2986_s21  ;;  %p2994_p10 = scmp.lt.s32.totalorder %s273_s27, %s273_s27 }
  0x27   : > { %p2977_p4 = pneg %p3406_p2  ;;  %p2995_p12 = scmp.lt.s32.totalorder %s2986_s21, %s2986_s21 }
  0x29   : > { %p2989_p7 = pnand %p2987_p6, %p2977_p4  ;;  %p2996_p11 = por %p2995_p12, %p2994_p10 }
  0x2b   : > { %p2990_p8 = pneg %p2989_p7 }
  0x2d   : > { %p2997_p0 = pnand %p2996_p11, %p2990_p8 }
  0x2f   : > { %3000 = shalt.err (!%p2997_p0)
}
  0x30   : > { %s3244_s23 = smov 128   ;;  %s3245_s24 = smov 8  }
  0x31   : > { %s3886_s5 = sld [smem:[#allocation32_spill]]  ;;  %s3012_s20 = scalar_lea.vmem %s286_s17, 12288 }
  0x32   : > { %p3013_p1 = scmp.ne.s32.totalorder %s286_s17, %s3012_s20  ;;  %p3020_p9 = scmp.lt.s32.totalorder %s286_s17, %s286_s17 }
  0x33   : > { %p3021_p5 = scmp.lt.s32.totalorder %s3012_s20, %s3012_s20 }
  0x34   : > { %p3015_p6 = pnand %p3013_p1, %p2977_p4 }
  0x35   : > { %p3022_p10 = por %p3021_p5, %p3020_p9 }
  0x36   : > { %p3016_p7 = pneg %p3015_p6 }
  0x37   : > { %2682 = dma.hbm_to_vmem [thread:$0]  (!%p3406_p2), %s3886_s5, 12288, %s273_s27, [#allocation8], %s3244_s23, %s3244_s23, %s3245_s24  }
  0x38   : > { %p3023_p11 = pnand %p3022_p10, %p3016_p7 }
  0x3a   : > { %3026 = shalt.err (!%p3023_p11)
}
  0x3b   : > { %s3887_s6 = sld [smem:[#allocation33_spill]]  ;;  %s36_s7 = sadd.s32 1, %s3232_s12 }
  0x3c   : > { %s39_s20 = sadd.s32 1, %s3236_s13  ;;  %p37_p1 = scmp.ge.s32.totalorder %s36_s7, 3 }
  0x3d   : > { %p127_p5 = scmp.lt.s32.totalorder %s3232_s12, 2  ;;  %s136_s27 = sadd.s32 1, %s3220_s9 }
  0x3e   : > { %p143_p9 = scmp.ne.s32.totalorder %s3220_s9, %s3216_s8  ;;  %s3938_s7 = smov (%p37_p1, %s36_s7), 0 }
  0x3f   : > { %3888 = sst [smem:[#allocation25_spill]] %s3938_s7  ;;  %s3940_s20 = smov (!%p37_p1, %s39_s20), %s3236_s13 }
  0x40   : > { %s128_s2 = scalar_select %p127_p5, %s3232_s12, 2 }
  0x41   : > { %2685 = dma.hbm_to_vmem [thread:$0]  (!%p3406_p2), %s3887_s6, 12288, %s286_s17, [#allocation11], %s3244_s23, %s3244_s23, %s3245_s24  }
  0x42   : > { %p41_p4 = scmp.ge.s32.totalorder %s3940_s20, 2  ;;  %p129_p2 = scmp.lt.s32.totalorder %s3938_s7, 2 }
  0x43   : > { %p144_p8 = scmp.eq.s32.totalorder %s3240_s14, 0  ;;  %p2699_p12 = scmp.lt.s32.totalorder %s3240_s14, 6 }
  0x44   : > { %s3942_s20 = smov (%p41_p4, %s3940_s20), 0  ;;  %s324_s16 = sand.u32 1, %s3220_s9  }
  0x45   : > { %3889 = sst [smem:[#allocation26_spill]] %s3942_s20  ;;  %s3446_s17 = ssub.s32 %s3236_s13, %s3942_s20 }
  0x46   : > { %s130_s24 = scalar_select %p129_p2, %s3938_s7, 2 }
  0x47   : > { %p145_p0 = por %p144_p8, %p143_p9  ;;  %p234_p6 = scmp.eq.s32.totalorder %s3446_s17, 0 }
  0x48   : > { %s132_s30 = ssub.s32 %s128_s2, %s130_s24  ;;  %s3890_s21 = sadd.s32 1, %s3196_s26 }
  0x49   : > { %s133_s23 = sor.u32 %s132_s30, %s3446_s17  ;;  %s2657_s12 = smul.u32 384, %s324_s16 }
  0x4a   : > { %p134_p7 = scmp.eq.s32.totalorder %s133_s23, 0  ;;  %p3465_p10 = pnand %p2699_p12, %p145_p0 }
  0x4b   : > { %s3458_s5 = scalar_select %p234_p6, %s3196_s26, %s3890_s21  }
  0x4c   : > { %s3461_s6 = scalar_select %p134_p7, %s3220_s9, %s136_s27  }
  0x4d   : > { %3891 = sst [smem:[#allocation27_spill]] %s3458_s5  ;;  %s2658_s7 = smul.u32 96, %s128_s2 }
  0x4e   : > { %3892 = sst [smem:[#allocation28_spill]] %s3461_s6  ;;  %s2659_s1 = smul.u32 288, %s3236_s13 }
  0x4f   : > { %s328_s24 = scalar_lea.vmem [#allocation4], %s2657_s12  ;;  %s325_s27 = scalar_lea.sflag [#allocation5], %s324_s16 }
  0x50   : > { %s340_s0 = sshll.u32 %s328_s24, 4  ;;  %s337_s30 = sadd.s32 %s2659_s1, %s2658_s7  ;;  %s341_s0 = int_to_ptr.vmem [resolvable:$true] %s340_s0 }
  0x51   : > { %s2323_s23 = sshll.u32 %s337_s30, 6  ;;  %p3029_p11 = pneg %p3465_p10 }
  0x52   : > { %s339_s21 = scalar_lea.hbm %s3847_s3, %s2323_s23  ;;  %s3040_s6 = scalar_lea.vmem %s341_s0, 6144 }
  0x53   : > { %p3041_p1 = scmp.ne.s32.totalorder %s341_s0, %s3040_s6  ;;  %s3246_s9 = smov [#allocation4]  }
  0x54   : > { %s3045_s5 = sshll.u32 %s3246_s9, 4  ;;  %s3046_s5 = int_to_ptr.vmem [resolvable:$false] %s3045_s5 }
  0x55   : > { %p3043_p5 = pnand %p3041_p1, %p3029_p11  ;;  %s3047_s2 = scalar_lea.vmem %s3046_s5, 12288 }
  0x56   : > { %p3048_p4 = scmp.lt.s32.totalorder %s341_s0, %s3046_s5  ;;  %p3049_p2 = scmp.lt.s32.totalorder %s3047_s2, %s3040_s6 }
  0x57   : > { %p3044_p9 = pneg %p3043_p5 }
  0x58   : > { %p3050_p0 = por %p3049_p2, %p3048_p4 }
  0x5a   : > { %p3051_p7 = pnand %p3050_p0, %p3044_p9 }
  0x5c   : > { %3054 = shalt.err (!%p3051_p7)
}
  0x5d   : > { %s3247_s1 = smov 384   ;;  %s3248_s9 = smov 24  }
  0x5e   : > { %2689 = dma.hbm_to_vmem [thread:$0]  (!%p3465_p10), %s339_s21, 6144, %s341_s0, %s325_s27, %s3247_s1, %s3247_s1, %s3248_s9  }
  0x5f   : > { %s168_s5 = sadd.s32 1, %s3208_s29  ;;  %p175_p11 = scmp.ne.s32.totalorder %s3208_s29, %s3204_s28 }
  0x60   : > { %s350_s6 = sand.u32 1, %s3240_s14   ;;  %s352_s10 = sand.u32 1, %s3208_s29  }
  0x61   : > { %p177_p1 = por %p175_p11, %p144_p8  ;;  %s2660_s11 = smul.u32 360, %s352_s10 }
  0x62   : > { %s3496_s7 = scalar_select %p234_p6, %s3208_s29, %s168_s5  }
  0x63   : > { %p3489_p5 = pnand %p2699_p12, %p177_p1  ;;  %s354_s20 = scalar_lea.vmem [#allocation7], %s2660_s11 }
  0x64   : > { %s366_s16 = sshll.u32 %s354_s20, 4  ;;  %s3185_s0 = smul.u32 5760, %s3236_s13  ;;  %s3498_s16 = int_to_ptr.vmem [resolvable:$true] %s366_s16 }
  0x65   : > { %s351_s21 = scalar_lea.sflag [#allocation8], %s350_s6  ;;  %p3057_p12 = pneg %p3489_p5 }
  0x66   : > { %s365_s23 = scalar_lea.hbm %s3848_s4, %s3185_s0  ;;  %s3060_s5 = scalar_lea.hbm %s3848_s4, 11520 }
  0x67   : > { %s3055_s27 = scalar_lea.hbm %s365_s23, 5760 }
  0x68   : > { %p3056_p8 = scmp.ne.s32.totalorder %s365_s23, %s3055_s27  ;;  %p3062_p6 = scmp.lt.s32.totalorder %s3060_s5, %s3055_s27 }
  0x6a   : > { %p3058_p10 = pnand %p3057_p12, %p3056_p8 }
  0x6c   : > { %p3059_p9 = pneg %p3058_p10 }
  0x6e   : > { %p3064_p4 = pnand %p3062_p6, %p3059_p9 }
  0x70   : > { %3067 = shalt.err (!%p3064_p4)
}
  0x71   : > { %s3068_s10 = scalar_lea.vmem %s3498_s16, 5760  ;;  %s3249_s6 = smov [#allocation7]  }
  0x72   : > { %p3069_p2 = scmp.ne.s32.totalorder %s3498_s16, %s3068_s10  ;;  %s3073_s11 = sshll.u32 %s3249_s6, 4  ;;  %s3074_s11 = int_to_ptr.vmem [resolvable:$false] %s3073_s11 }
  0x73   : > { %s3075_s20 = scalar_lea.vmem %s3074_s11, 11520  ;;  %p3076_p11 = scmp.lt.s32.totalorder %s3498_s16, %s3074_s11 }
  0x74   : > { %p3071_p0 = pnand %p3069_p2, %p3057_p12  ;;  %p3077_p1 = scmp.lt.s32.totalorder %s3075_s20, %s3068_s10 }
  0x76   : > { %p3072_p7 = pneg %p3071_p0  ;;  %p3078_p8 = por %p3077_p1, %p3076_p11 }
  0x78   : > { %p3079_p10 = pnand %p3078_p8, %p3072_p7 }
  0x7a   : > { %3082 = shalt.err (!%p3079_p10)
}
  0x7b   : > { %2692 = dma.hbm_to_vmem [thread:$0]  (!%p3489_p5), %s365_s23, 5760, %s3498_s16, %s351_s21, %s3247_s1, %s3247_s1, %s3248_s9  }
  0x7c   : > { %378 = sbr.rel (%p3398_p13) target bundleno = 1259 (0x4eb), region = 48  ;;  %s380_s0 = sand.u32 (!%p3398_p13), 1, %s3216_s8  }
  0x7d   : > { %s2663_s24 = smul.u32 (!%p3398_p13), 384, %s380_s0  ;;  %s381_s30 = scalar_lea.sflag (!%p3398_p13), [#allocation5], %s380_s0 }
  0x7f   : > { %s3521_s27 = scalar_lea.vmem (!%p3398_p13), [#allocation4], %s2663_s24 }
  0x81   : > { %3166 = dma.done.wait (%p3373_p3), %s381_s30, 6144  }
  0x82   : > { %3168 = vsyncadd (%p3373_p3), %s381_s30, 4294961152  ;;  %s389_s12 = sand.u32 1, %s3364_s15   ;;  %s391_s1 = sand.u32 1, %s3204_s28  }
  0x83   : > { %s2664_s9 = smul.u32 360, %s391_s1  ;;  %s390_s22 = scalar_lea.sflag [#allocation8], %s389_s12 }
  0x84   : > { %p3895_p13 = scmp.ne.s32.totalorder %s3879_s19, 0 }
  0x85   : > { %s3529_s16 = scalar_lea.vmem [#allocation7], %s2664_s9 }
  0x86   : > { %3170 = dma.done.wait (%p3895_p13), %s390_s22, 5760  }
  0x87   : > { %3172 = vsyncadd (%p3895_p13), %s390_s22, 4294961536  ;;  %p3896_p5 = scmp.eq.s32.totalorder %s3364_s15, 0 }
  0x89   : > { %3174 = dma.done.wait (%p3896_p5), [#allocation8], 12288   ;;  %p3897_p12 = pmov %p3896_p5 }
  0x8a   : > { %p3898_p3 = pmov %p3896_p5 }
  0x8b   : > { %3176 = vsyncadd (%p3897_p12), [#allocation8], 4294955008 }
  0x8c   : > { %3178 = dma.done.wait (%p3898_p3), [#allocation11], 12288   ;;  %p3899_p9 = pmov %p3898_p3 }
  0x8d   : > { %s3900_s18 = sld [smem:[#allocation21_spill]]  ;;  %s448_s19 = sand.u32 1, %s3192_s25  }
  0x8e   : > { %3180 = vsyncadd (%p3899_p9), [#allocation11], 4294955008  ;;  %s3901_s23 = sld [smem:[#allocation20_spill]]  ;;  %s3568_s9 = scalar_lea.vmem [#allocation12], %s448_s19 }
  0x8f   : > { %s3902_s5 = sld [smem:[#allocation29_spill]] }
  0x90   : > { %s3903_s11 = sld [smem:[#allocation30_spill]] }
  0x91   : > { %s3904_s12 = sld [smem:[#allocation31_spill]] }
  0x93   : > { %p450_p6 = scmp.lt.s32.totalorder %s3900_s18, 1 }
  0x94   : > { %p456_p4 = scmp.lt.s32.totalorder %s3901_s23, 0  ;;  %p2331_p2 = scmp.ne.s32.totalorder %s3901_s23, 0 }
  0x95   : > { %s3944_s18 = smov (!%p450_p6, %s3900_s18), 1 }
  0x96   : > { %s457_s21 = scalar_select %p456_p4, %s3901_s23, 0 }
  0x97   : > { %s3554_s15 = scalar_lea.vmem %s3902_s5, %s3944_s18  ;;  %s455_s20 = scalar_lea.vmem %s3903_s11, %s3944_s18 }
  0x98   : > { %s3946_s21 = smov (!%p456_p4, %s457_s21), 0  ;;  %476 = sbr.rel (%p2331_p2) target bundleno = 161 (0xa1), region = 68 }
  0x99   : > { %s462_s0 = sadd.s32 %s3946_s21, %s3944_s18 }
  0x9a   : > { %s3564_s1 = scalar_lea.vmem %s3904_s12, %s462_s0 }
  0x9d   : > { %v477_v0 = vlaneseq  ;;  %v3250_v1 = vmov 0.0  }
  0x9f   : > { %vm479_vm0 = vcmp.lt.s32.totalorder %v477_v0, 768 }
  0xa0   : > { %481 = vst.msk [vmem:[#allocation2] sm:$0x3f] %vm479_vm0, %v3250_v1  ;;  %482 = vst.msk [vmem:[#allocation3] sm:$0x3f] %vm479_vm0, %v3250_v1 }
  0xa1 PF: > { %v536_v2 = vld [vmem:[%s3554_s15] sm:$0x1]  ;;  %v3251_v3 = vmov 0   ;;  %v2831_v5 = vld [vmem:[%s3521_s27 + $0x150] ss:$24 sps:$4 sm:$0xff]   ;;  %s3905_s22 = sld [smem:[#allocation20_spill]]  ;;  %v531_v37 = vlaneseq }
  0xa2   : > { %2828 = vset.pattern.permute.xlu0 %v3251_v3  ;;  %v2829_v4 = vld [vmem:[%s3521_s27 + $0x154] ss:$24 sps:$4 sm:$0xff]   ;;  %821 = vmatprep.mubr.bf16.mxu0 %v3251_v3  ;;  %v2834_v7 = vld [vmem:[%s3521_s27 + $0x158] ss:$24 sps:$4 sm:$0xff]   ;;  %v2835_v8 = vld [vmem:[%s3521_s27 + $0x124] ss:$24 sps:$4 sm:$0xff]  }
  0xa3   : > { %538 = vperm.xlu0 %2828, %v536_v2   ;;  %v2832_v6 = vld [vmem:[%s3521_s27 + $0x15c] ss:$24 sps:$4 sm:$0xff]   ;;  %862 = vmatprep.mubr.bf16.mxu1 %v3251_v3  ;;  %v2837_v9 = vld [vmem:[%s3521_s27 + $0x120] ss:$24 sps:$4 sm:$0xff]   ;;  %v2838_v10 = vld [vmem:[%s3521_s27 + $0x12c] ss:$24 sps:$4 sm:$0xff]  }
  0xa4   : > { %789 = vmatprep.subr.bf16.mxu0 %v2829_v4  ;;  %830 = vmatprep.subr.bf16.mxu1 %v2832_v6  ;;  %v2840_v11 = vld [vmem:[%s3521_s27 + $0x128] ss:$24 sps:$4 sm:$0xff]   ;;  %v2841_v12 = vld [vmem:[%s3521_s27 + $0xf4] ss:$24 sps:$4 sm:$0xff]   ;;  %v2846_v15 = vld [vmem:[%s3521_s27 + $0xf8] ss:$24 sps:$4 sm:$0xff]  }
  0xa5   : > { %790 = vmatpush1.bf16.msra.mxu0 %v2831_v5  ;;  %831 = vmatpush1.bf16.msra.mxu1 %v2834_v7  ;;  %v2844_v13 = vld [vmem:[%s3521_s27 + $0xfc] ss:$24 sps:$4 sm:$0xff]   ;;  %v2843_v14 = vld [vmem:[%s3521_s27 + $0xf0] ss:$24 sps:$4 sm:$0xff]   ;;  %v2850_v17 = vld [vmem:[%s3521_s27 + $0xcc] ss:$24 sps:$4 sm:$0xff]  }
  0xa6   : > { %791 = vmatprep.subr.bf16.mxu0 %v2835_v8  ;;  %832 = vmatprep.subr.bf16.mxu1 %v2838_v10  ;;  %v2847_v16 = vld [vmem:[%s3521_s27 + $0xc4] ss:$24 sps:$4 sm:$0xff]   ;;  %v2849_v18 = vld [vmem:[%s3521_s27 + $0xc0] ss:$24 sps:$4 sm:$0xff]   ;;  %v2853_v20 = vld [vmem:[%s3521_s27 + $0x94] ss:$24 sps:$4 sm:$0xff]  }
  0xa7   : > { %v2852_v19 = vld [vmem:[%s3521_s27 + $0xc8] ss:$24 sps:$4 sm:$0xff]   ;;  %v2856_v21 = vld [vmem:[%s3521_s27 + $0x9c] ss:$24 sps:$4 sm:$0xff]   ;;  %v2858_v23 = vld [vmem:[%s3521_s27 + $0x98] ss:$24 sps:$4 sm:$0xff]  }
  0xa8   : > { %v2855_v22 = vld [vmem:[%s3521_s27 + $0x90] ss:$24 sps:$4 sm:$0xff]   ;;  %v2859_v24 = vld [vmem:[%s3521_s27 + $0x64] ss:$24 sps:$4 sm:$0xff]   ;;  %v2861_v26 = vld [vmem:[%s3521_s27 + $0x60] ss:$24 sps:$4 sm:$0xff]  }
  0xa9   : > { %792 = vmatpush1.bf16.msra.mxu0 %v2837_v9  ;;  %833 = vmatpush1.bf16.msra.mxu1 %v2840_v11  ;;  %v2862_v25 = vld [vmem:[%s3521_s27 + $0x6c] ss:$24 sps:$4 sm:$0xff]   ;;  %v2864_v27 = vld [vmem:[%s3521_s27 + $0x68] ss:$24 sps:$4 sm:$0xff]   ;;  %v2868_v29 = vld [vmem:[%s3521_s27 + $0x3c] ss:$24 sps:$4 sm:$0xff]  }
  0xaa   : > { %793 = vmatprep.subr.bf16.mxu0 %v2841_v12  ;;  %834 = vmatprep.subr.bf16.mxu1 %v2844_v13  ;;  %v2865_v28 = vld [vmem:[%s3521_s27 + $0x34] ss:$24 sps:$4 sm:$0xff]   ;;  %v2867_v30 = vld [vmem:[%s3521_s27 + $0x30] ss:$24 sps:$4 sm:$0xff]   ;;  %v2871_v32 = vld [vmem:[%s3521_s27 + $0x4] ss:$24 sps:$4 sm:$0xff]  }
  0xab   : > { %v2870_v31 = vld [vmem:[%s3521_s27 + $0x38] ss:$24 sps:$4 sm:$0xff]   ;;  %v2874_v33 = vld [vmem:[%s3521_s27 + $0xc] ss:$24 sps:$4 sm:$0xff]   ;;  %v2876_v35 = vld [vmem:[%s3521_s27 + $0x8] ss:$24 sps:$4 sm:$0xff]  }
  0xac   : > { %v2873_v34 = vld [vmem:[%s3521_s27] ss:$24 sps:$4 sm:$0xff]   ;;  %v2879_v36 = vld [vmem:[%s3521_s27 + $0x164] ss:$24 sps:$4 sm:$0xff]   ;;  %s2332_s23 = sshll.u32 %s3905_s22, 7  ;;  %v3610_v38 = vshrl.u32 %v531_v37, 7 }
  0xad   : > { %794 = vmatpush1.bf16.msra.mxu0 %v2843_v14  ;;  %835 = vmatpush1.bf16.msra.mxu1 %v2846_v15  ;;  %v532_v39 = vand.u32 127, %v531_v37  ;;  %v534_v40 = vstv %s2332_s23  ;;  %v2877_v45 = vld [vmem:[%s3521_s27 + $0x160] ss:$24 sps:$4 sm:$0xff]   ;;  %v2882_v46 = vld [vmem:[%s3521_s27 + $0x134] ss:$24 sps:$4 sm:$0xff]   ;;  %vm3652_vm3 = vcmp.lt.s32.totalorder %v531_v37, 768 }
  0xae   : > { %795 = vmatprep.subr.bf16.mxu0 %v2847_v16  ;;  %836 = vmatprep.subr.bf16.mxu1 %v2850_v17  ;;  %v3614_v41 = vsub.s32 0, %v3610_v38  ;;  %v3252_v48 = vmov 1.0|1.0   ;;  %v2880_v49 = vld [vmem:[%s3521_s27 + $0x130] ss:$24 sps:$4 sm:$0xff]   ;;  %p2388_p0 = scmp.ge.s32.totalorder %s3905_s22, 1 }
  0xaf   : > { %v535_v42 = vadd.s32 %v534_v40, %v532_v39  ;;  %v2885_v50 = vld [vmem:[%s3521_s27 + $0x104] ss:$24 sps:$4 sm:$0xff]   ;;  %v2883_v51 = vld [vmem:[%s3521_s27 + $0x100] ss:$24 sps:$4 sm:$0xff]   ;;  %v2888_v52 = vld [vmem:[%s3521_s27 + $0xd4] ss:$24 sps:$4 sm:$0xff]  }
  0xb0   : > { %v2886_v53 = vld [vmem:[%s3521_s27 + $0xd0] ss:$24 sps:$4 sm:$0xff]   ;;  %v2891_v54 = vld [vmem:[%s3521_s27 + $0xa4] ss:$24 sps:$4 sm:$0xff]   ;;  %v2889_v55 = vld [vmem:[%s3521_s27 + $0xa0] ss:$24 sps:$4 sm:$0xff]  }
  0xb1   : > { %796 = vmatpush1.bf16.msra.mxu0 %v2849_v18  ;;  %837 = vmatpush1.bf16.msra.mxu1 %v2852_v19  ;;  %v2894_v56 = vld [vmem:[%s3521_s27 + $0x74] ss:$24 sps:$4 sm:$0xff]   ;;  %v2892_v57 = vld [vmem:[%s3521_s27 + $0x70] ss:$24 sps:$4 sm:$0xff]   ;;  %v2897_v58 = vld [vmem:[%s3521_s27 + $0x44] ss:$24 sps:$4 sm:$0xff]  }
  0xb2   : > { %797 = vmatprep.subr.bf16.mxu0 %v2853_v20  ;;  %838 = vmatprep.subr.bf16.mxu1 %v2856_v21  ;;  %v2895_v59 = vld [vmem:[%s3521_s27 + $0x40] ss:$24 sps:$4 sm:$0xff]   ;;  %v2900_v60 = vld [vmem:[%s3521_s27 + $0x14] ss:$24 sps:$4 sm:$0xff]   ;;  %v2898_v61 = vld [vmem:[%s3521_s27 + $0x10] ss:$24 sps:$4 sm:$0xff]  }
  0xb3   : > { %v3253_v6 = vmov 1966171168  }
  0xb4   : > { %v922_v7 = vunpack.c.l.s4 %v3253_v6 }
  0xb5   : > { %798 = vmatpush1.bf16.msra.mxu0 %v2855_v22  ;;  %839 = vmatpush1.bf16.msra.mxu1 %v2858_v23  ;;  %v548_v23 = vld [vmem:[#allocation2] sm:$0x3f] }
  0xb6   : > { %799 = vmatprep.subr.bf16.mxu0 %v2859_v24  ;;  %840 = vmatprep.subr.bf16.mxu1 %v2862_v25  ;;  %v923_v8 = vunpack.c.0.s8 %v922_v7 }
  0xb8   : > { %v3644_v9 = vsub.s32 %v923_v8, %v3610_v38 }
  0xb9   : > { %800 = vmatpush1.bf16.msra.mxu0 %v2861_v26  ;;  %841 = vmatpush1.bf16.msra.mxu1 %v2864_v27 }
  0xba   : > { %801 = vmatprep.subr.bf16.mxu0 %v2865_v28  ;;  %842 = vmatprep.subr.bf16.mxu1 %v2868_v29 }
  0xbd   : > { %802 = vmatpush1.bf16.msra.mxu0 %v2867_v30  ;;  %843 = vmatpush1.bf16.msra.mxu1 %v2870_v31 }
  0xbe   : > { %803 = vmatprep.subr.bf16.mxu0 %v2871_v32  ;;  %844 = vmatprep.subr.bf16.mxu1 %v2874_v33 }
  0xc1   : > { %804 = vmatpush1.bf16.msra.mxu0 %v2873_v34  ;;  %845 = vmatpush1.bf16.msra.mxu1 %v2876_v35 }
  0xc2   : > { %871 = vmatprep.subr.bf16.mxu0 %v2879_v36 }
 0x11e   : > { %v539_v43 = vpop.permute.xlu0 %538 }
 0x11f   : > { %v543_v44 = vrot.slane %v539_v43, %v3614_v41 }
 0x121   : > { %vm544_vm1 = vcmp.lt.s32.totalorder %v535_v42, %v543_v44 }
 0x122   : > { %vm3619_vm2 = vmpackc.low %vm544_vm1, %vm544_vm1 }
 0x123   : > { %2383 = vmatmul.mubr.msk.bf16.vlgmr.msra.gmra.mxu0 %vm3619_vm2, %v3252_v48  ;;  %2385 = vmatmul.mubr.msk.bf16.vlgmr.msra.gmra.mxu1 %vm3619_vm2, %v3252_v48 }
 0x124   : > { %872 = vmatpush1.bf16.msra.mxu0 %v2877_v45  ;;  %903 = vmatprep.mubr.bf16.mxu0 %v3251_v3 }
 0x125   : > { %873 = vmatprep.subr.bf16.mxu0 %v2882_v46 }
 0x128   : > { %874 = vmatpush1.bf16.msra.mxu0 %v2880_v49 }
 0x129   : > { %875 = vmatprep.subr.bf16.mxu0 %v2885_v50 }
 0x12c   : > { %876 = vmatpush1.bf16.msra.mxu0 %v2883_v51 }
 0x12d   : > { %877 = vmatprep.subr.bf16.mxu0 %v2888_v52 }
 0x130   : > { %878 = vmatpush1.bf16.msra.mxu0 %v2886_v53 }
 0x131   : > { %879 = vmatprep.subr.bf16.mxu0 %v2891_v54 }
 0x134   : > { %880 = vmatpush1.bf16.msra.mxu0 %v2889_v55 }
 0x135   : > { %881 = vmatprep.subr.bf16.mxu0 %v2894_v56 }
 0x138   : > { %882 = vmatpush1.bf16.msra.mxu0 %v2892_v57 }
 0x139   : > { %883 = vmatprep.subr.bf16.mxu0 %v2897_v58 }
 0x13c   : > { %884 = vmatpush1.bf16.msra.mxu0 %v2895_v59 }
 0x13d   : > { %885 = vmatprep.subr.bf16.mxu0 %v2900_v60 }
 0x140   : > { %886 = vmatpush1.bf16.msra.mxu0 %v2898_v61 }
 0x143   : > { %2387 = vmatmul.mubr.msk.bf16.vlgmr.msra.gmra.mxu0 %vm3619_vm2, %v3252_v48 }
 0x1e3   : > { %v823_v62 = vpop.f32.mrf.mxu0  ;;  %v864_v63 = vpop.f32.mrf.mxu1 }
 0x1e5   : > { %v825_v0 = vpop.f32.mrf.mxu0  ;;  %v866_v1 = vpop.f32.mrf.mxu1 }
 0x1e6   : > { %v918_v10 = vcombine.low %v823_v62, %v825_v0  ;;  %v919_v11 = vcombine.low %v864_v63, %v866_v1 }
 0x1e7   : > { %v827_v2 = vpop.f32.mrf.mxu0  ;;  %v868_v3 = vpop.f32.mrf.mxu1 }
 0x1e8   : > { %v927_v12 = vrot.slane %v918_v10, %v3644_v9  ;;  %v934_v13 = vrot.slane %v919_v11, %v3644_v9 }
 0x1e9   : > { %v828_v4 = vpop.f32.mrf.mxu0  ;;  %v869_v5 = vpop.f32.mrf.mxu1 }
 0x1ea   : > { %v942_v16 = vcombine.low %v927_v12, %v934_v13 }
 0x1ec   : > { %v949_v21 = vrot.slane %v942_v16, %v3644_v9 }
 0x203   : > { %v905_v14 = vpop.f32.mrf.mxu0 }
 0x205   : > { %v907_v15 = vpop.f32.mrf.mxu0 }
 0x206   : > { %v920_v17 = vcombine.low %v905_v14, %v907_v15 }
 0x207   : > { %v909_v18 = vpop.f32.mrf.mxu0 }
 0x208   : > { %v941_v19 = vrot.slane %v920_v17, %v3644_v9 }
 0x209   : > { %v910_v20 = vpop.f32.mrf.mxu0 }
 0x20a   : > { %v956_v22 = vrot.slane %v941_v19, %v3644_v9 }
 0x20c   : > { %v957_v24 = vcombine.low %v949_v21, %v956_v22  ;;  %968 = sbr.rel (%p2388_p0) target bundleno = 802 (0x322), region = 72 }
 0x20e   : > { %v959_v26 = vadd.f32 %v957_v24, %v548_v23 }
 0x210   : > { %964 = vst.msk [vmem:[#allocation2] sm:$0x3f] %vm3652_vm3, %v959_v26 }
 0x211   : > { %v1013_v27 = vld [vmem:[%s3529_s16 + $0x150] sm:$0xff]  ;;  %vm1245_vm4 = vcmask 1043456   ;;  %v1014_v28 = vld [vmem:[%s3529_s16 + $0x158] sm:$0xff]  ;;  %v3254_v34 = vmov 0   ;;  %v2907_v35 = vld [vmem:[%s3529_s16 + $0x12c] ss:$24 sps:$4 sm:$0xff]  }
 0x212   : > { %v2432_v29 = vcombine.high %v1013_v27, %v1013_v27  ;;  %v2434_v30 = vcombine.high %v1014_v28, %v1014_v28  ;;  %v2431_v31 = vcombine.low %v1013_v27, %v1013_v27  ;;  %v2433_v32 = vcombine.low %v1014_v28, %v1014_v28  ;;  %v2905_v33 = vld [vmem:[%s3529_s16 + $0x124] ss:$24 sps:$4 sm:$0xff]   ;;  %1296 = vmatprep.mubr.bf16.mxu0 %v3254_v34  ;;  %v2909_v39 = vld [vmem:[%s3529_s16 + $0x120] ss:$24 sps:$4 sm:$0xff]   ;;  %v2911_v42 = vld [vmem:[%s3529_s16 + $0xf4] ss:$24 sps:$4 sm:$0xff]  }
 0x213   : > { %1337 = vmatprep.mubr.bf16.mxu1 %v3254_v34  ;;  %v2910_v40 = vld [vmem:[%s3529_s16 + $0x128] ss:$24 sps:$4 sm:$0xff]   ;;  %v2913_v43 = vld [vmem:[%s3529_s16 + $0xfc] ss:$24 sps:$4 sm:$0xff]   ;;  %v2916_v45 = vld [vmem:[%s3529_s16 + $0xf8] ss:$24 sps:$4 sm:$0xff]  }
 0x214   : > { %2437 = vmatprep.subr.msk.bf16.mxu0 %vm1245_vm4, %v2432_v29  ;;  %2439 = vmatprep.subr.msk.bf16.mxu1 %vm1245_vm4, %v2434_v30  ;;  %v1247_v36 = vsel %vm1245_vm4, %v2431_v31, 0  ;;  %v1253_v37 = vsel %vm1245_vm4, %v2433_v32, 0  ;;  %v2915_v44 = vld [vmem:[%s3529_s16 + $0xf0] ss:$24 sps:$4 sm:$0xff]   ;;  %v2917_v46 = vld [vmem:[%s3529_s16 + $0xc4] ss:$24 sps:$4 sm:$0xff]  }
 0x215   : > { %1265 = vmatpush1.bf16.msra.mxu0 %v1247_v36  ;;  %1306 = vmatpush1.bf16.msra.mxu1 %v1253_v37  ;;  %v2919_v47 = vld [vmem:[%s3529_s16 + $0xcc] ss:$24 sps:$4 sm:$0xff]   ;;  %v2921_v48 = vld [vmem:[%s3529_s16 + $0xc0] ss:$24 sps:$4 sm:$0xff]   ;;  %v2925_v51 = vld [vmem:[%s3529_s16 + $0x9c] ss:$24 sps:$4 sm:$0xff]  }
 0x216   : > { %1266 = vmatprep.subr.bf16.mxu0 %v2905_v33  ;;  %1307 = vmatprep.subr.bf16.mxu1 %v2907_v35  ;;  %v2922_v49 = vld [vmem:[%s3529_s16 + $0xc8] ss:$24 sps:$4 sm:$0xff]   ;;  %v2923_v50 = vld [vmem:[%s3529_s16 + $0x94] ss:$24 sps:$4 sm:$0xff]   ;;  %v2928_v53 = vld [vmem:[%s3529_s16 + $0x98] ss:$24 sps:$4 sm:$0xff]  }
 0x217   : > { %v2927_v52 = vld [vmem:[%s3529_s16 + $0x90] ss:$24 sps:$4 sm:$0xff]   ;;  %v2929_v54 = vld [vmem:[%s3529_s16 + $0x64] ss:$24 sps:$4 sm:$0xff]   ;;  %v2933_v56 = vld [vmem:[%s3529_s16 + $0x60] ss:$24 sps:$4 sm:$0xff]  }
 0x218   : > { %v2931_v55 = vld [vmem:[%s3529_s16 + $0x6c] ss:$24 sps:$4 sm:$0xff]   ;;  %v2934_v57 = vld [vmem:[%s3529_s16 + $0x68] ss:$24 sps:$4 sm:$0xff]   ;;  %v2937_v59 = vld [vmem:[%s3529_s16 + $0x3c] ss:$24 sps:$4 sm:$0xff]  }
 0x219   : > { %1267 = vmatpush1.bf16.msra.mxu0 %v2909_v39  ;;  %1308 = vmatpush1.bf16.msra.mxu1 %v2910_v40  ;;  %v2935_v58 = vld [vmem:[%s3529_s16 + $0x34] ss:$24 sps:$4 sm:$0xff]   ;;  %v2939_v60 = vld [vmem:[%s3529_s16 + $0x30] ss:$24 sps:$4 sm:$0xff]   ;;  %v2941_v62 = vld [vmem:[%s3529_s16 + $0x4] ss:$24 sps:$4 sm:$0xff]  }
 0x21a   : > { %1268 = vmatprep.subr.bf16.mxu0 %v2911_v42  ;;  %1309 = vmatprep.subr.bf16.mxu1 %v2913_v43  ;;  %v2940_v61 = vld [vmem:[%s3529_s16 + $0x38] ss:$24 sps:$4 sm:$0xff]   ;;  %v2943_v63 = vld [vmem:[%s3529_s16 + $0xc] ss:$24 sps:$4 sm:$0xff]   ;;  %v2946_v2 = vld [vmem:[%s3529_s16 + $0x8] ss:$24 sps:$4 sm:$0xff]  }
 0x21b   : > { %v1015_v0 = vld [vmem:[%s3529_s16 + $0x160] sm:$0xff]  ;;  %v970_v5 = vld [vmem:[%s3564_s1] sm:$0x1]  ;;  %vm1241_vm5 = vcmask 982016   ;;  %v2949_v8 = vld [vmem:[%s3529_s16 + $0x130] ss:$24 sps:$4 sm:$0xff]  }
 0x21c   : > { %v2945_v1 = vld [vmem:[%s3529_s16] ss:$24 sps:$4 sm:$0xff]   ;;  %v2436_v3 = vcombine.high %v1015_v0, %v1015_v0  ;;  %v2435_v4 = vcombine.low %v1015_v0, %v1015_v0  ;;  %v2951_v7 = vld [vmem:[%s3529_s16 + $0x134] ss:$24 sps:$4 sm:$0xff]   ;;  %v2954_v10 = vld [vmem:[%s3529_s16 + $0x104] ss:$24 sps:$4 sm:$0xff]  }
 0x21d   : > { %1269 = vmatpush1.bf16.msra.mxu0 %v2915_v44  ;;  %1310 = vmatpush1.bf16.msra.mxu1 %v2916_v45  ;;  %v2952_v11 = vld [vmem:[%s3529_s16 + $0x100] ss:$24 sps:$4 sm:$0xff]   ;;  %v2957_v12 = vld [vmem:[%s3529_s16 + $0xd4] ss:$24 sps:$4 sm:$0xff]   ;;  %v2955_v13 = vld [vmem:[%s3529_s16 + $0xd0] ss:$24 sps:$4 sm:$0xff]  }
 0x21e   : > { %1270 = vmatprep.subr.bf16.mxu0 %v2917_v46  ;;  %1311 = vmatprep.subr.bf16.mxu1 %v2919_v47  ;;  %v1259_v6 = vsel %vm1245_vm4, %v2435_v4, 0  ;;  %v2960_v14 = vld [vmem:[%s3529_s16 + $0xa4] ss:$24 sps:$4 sm:$0xff]   ;;  %v2958_v15 = vld [vmem:[%s3529_s16 + $0xa0] ss:$24 sps:$4 sm:$0xff]  }
 0x21f   : > { %v2963_v16 = vld [vmem:[%s3529_s16 + $0x74] ss:$24 sps:$4 sm:$0xff]   ;;  %v2961_v17 = vld [vmem:[%s3529_s16 + $0x70] ss:$24 sps:$4 sm:$0xff]   ;;  %v2966_v18 = vld [vmem:[%s3529_s16 + $0x44] ss:$24 sps:$4 sm:$0xff]  }
 0x220   : > { %v2964_v19 = vld [vmem:[%s3529_s16 + $0x40] ss:$24 sps:$4 sm:$0xff]   ;;  %v2969_v20 = vld [vmem:[%s3529_s16 + $0x14] ss:$24 sps:$4 sm:$0xff]   ;;  %v2967_v21 = vld [vmem:[%s3529_s16 + $0x10] ss:$24 sps:$4 sm:$0xff]  }
 0x221   : > { %1271 = vmatpush1.bf16.msra.mxu0 %v2921_v48  ;;  %1312 = vmatpush1.bf16.msra.mxu1 %v2922_v49  ;;  %v969_v46 = vld [vmem:[#allocation3] sm:$0x3f] }
 0x222   : > { %1272 = vmatprep.subr.bf16.mxu0 %v2923_v50  ;;  %1313 = vmatprep.subr.bf16.mxu1 %v2925_v51 }
 0x225   : > { %1273 = vmatpush1.bf16.msra.mxu0 %v2927_v52  ;;  %1314 = vmatpush1.bf16.msra.mxu1 %v2928_v53 }
 0x226   : > { %1274 = vmatprep.subr.bf16.mxu0 %v2929_v54  ;;  %1315 = vmatprep.subr.bf16.mxu1 %v2931_v55 }
 0x229   : > { %1275 = vmatpush1.bf16.msra.mxu0 %v2933_v56  ;;  %1316 = vmatpush1.bf16.msra.mxu1 %v2934_v57 }
 0x22a   : > { %1276 = vmatprep.subr.bf16.mxu0 %v2935_v58  ;;  %1317 = vmatprep.subr.bf16.mxu1 %v2937_v59 }
 0x22d   : > { %1277 = vmatpush1.bf16.msra.mxu0 %v2939_v60  ;;  %1318 = vmatpush1.bf16.msra.mxu1 %v2940_v61 }
 0x22e   : > { %1278 = vmatprep.subr.bf16.mxu0 %v2941_v62  ;;  %1319 = vmatprep.subr.bf16.mxu1 %v2943_v63 }
 0x231   : > { %1279 = vmatpush1.bf16.msra.mxu0 %v2945_v1  ;;  %1320 = vmatpush1.bf16.msra.mxu1 %v2946_v2 }
 0x232   : > { %2441 = vmatprep.subr.msk.bf16.mxu0 %vm1245_vm4, %v2436_v3 }
 0x234   : > { %2438 = vmatmul.mubr.msk.bf16.vlgmr.msra.gmra.mxu0 %vm1241_vm5, %v970_v5  ;;  %2440 = vmatmul.mubr.msk.bf16.vlgmr.msra.gmra.mxu1 %vm1241_vm5, %v970_v5 }
 0x235   : > { %1347 = vmatpush1.bf16.msra.mxu0 %v1259_v6  ;;  %1378 = vmatprep.mubr.bf16.mxu0 %v3254_v34 }
 0x236   : > { %1348 = vmatprep.subr.bf16.mxu0 %v2951_v7 }
 0x239   : > { %1349 = vmatpush1.bf16.msra.mxu0 %v2949_v8 }
 0x23a   : > { %1350 = vmatprep.subr.bf16.mxu0 %v2954_v10 }
 0x23d   : > { %1351 = vmatpush1.bf16.msra.mxu0 %v2952_v11 }
 0x23e   : > { %1352 = vmatprep.subr.bf16.mxu0 %v2957_v12 }
 0x241   : > { %1353 = vmatpush1.bf16.msra.mxu0 %v2955_v13 }
 0x242   : > { %1354 = vmatprep.subr.bf16.mxu0 %v2960_v14 }
 0x245   : > { %1355 = vmatpush1.bf16.msra.mxu0 %v2958_v15 }
 0x246   : > { %1356 = vmatprep.subr.bf16.mxu0 %v2963_v16 }
 0x249   : > { %1357 = vmatpush1.bf16.msra.mxu0 %v2961_v17 }
 0x24a   : > { %1358 = vmatprep.subr.bf16.mxu0 %v2966_v18 }
 0x24d   : > { %1359 = vmatpush1.bf16.msra.mxu0 %v2964_v19 }
 0x24e   : > { %1360 = vmatprep.subr.bf16.mxu0 %v2969_v20 }
 0x251   : > { %1361 = vmatpush1.bf16.msra.mxu0 %v2967_v21 }
 0x254   : > { %2442 = vmatmul.mubr.msk.bf16.vlgmr.msra.gmra.mxu0 %vm1241_vm5, %v970_v5 }
 0x2f4   : > { %v1298_v22 = vpop.f32.mrf.mxu0  ;;  %v1339_v23 = vpop.f32.mrf.mxu1 }
 0x2f6   : > { %v1300_v24 = vpop.f32.mrf.mxu0  ;;  %v1341_v26 = vpop.f32.mrf.mxu1 }
 0x2f7   : > { %v1393_v31 = vcombine.low %v1298_v22, %v1300_v24  ;;  %v1394_v32 = vcombine.low %v1339_v23, %v1341_v26 }
 0x2f8   : > { %v1302_v27 = vpop.f32.mrf.mxu0  ;;  %v1343_v28 = vpop.f32.mrf.mxu1 }
 0x2f9   : > { %v1402_v33 = vrot.slane %v1393_v31, %v3644_v9  ;;  %v1409_v34 = vrot.slane %v1394_v32, %v3644_v9 }
 0x2fa   : > { %v1303_v29 = vpop.f32.mrf.mxu0  ;;  %v1344_v30 = vpop.f32.mrf.mxu1 }
 0x2fb   : > { %v1417_v37 = vcombine.low %v1402_v33, %v1409_v34 }
 0x2fd   : > { %v1424_v44 = vrot.slane %v1417_v37, %v3644_v9 }
 0x314   : > { %v1380_v35 = vpop.f32.mrf.mxu0 }
 0x316   : > { %v1382_v36 = vpop.f32.mrf.mxu0 }
 0x317   : > { %v1395_v39 = vcombine.low %v1380_v35, %v1382_v36 }
 0x318   : > { %v1384_v40 = vpop.f32.mrf.mxu0 }
 0x319   : > { %v1416_v42 = vrot.slane %v1395_v39, %v3644_v9 }
 0x31a   : > { %v1385_v43 = vpop.f32.mrf.mxu0 }
 0x31b   : > { %v1431_v45 = vrot.slane %v1416_v42, %v3644_v9 }
 0x31d   : > { %v1432_v47 = vcombine.low %v1424_v44, %v1431_v45 }
 0x31f   : > { %v1434_v48 = vadd.f32 %v1432_v47, %v969_v46 }
 0x321   : > { %1435 = vst.msk [vmem:[#allocation3] sm:$0x3f] %vm3652_vm3, %v1434_v48 }
 0x322 PF: > { %s3910_s27 = sld [smem:[#allocation20_spill]] }
 0x328   : > { %p2443_p7 = scmp.ne.s32.totalorder %s3910_s27, 2 }
 0x32a   : > { %1439 = sbr.rel (%p2443_p7) target bundleno = 1232 (0x4d0), region = 76 }
 0x32f   : > { %v1446_v49 = vld [vmem:[%s455_s20] sm:$0x1]  ;;  %v1599_v51 = vld [vmem:[#allocation10 + $0xf8] sm:$0xff]  ;;  %v3255_v9 = vmov 0   ;;  %v1598_v56 = vld [vmem:[#allocation10 + $0xf0] sm:$0xff] }
 0x330   : > { %v1440_v50 = vld [vmem:[%s3554_s15] sm:$0x1]  ;;  %2970 = vset.pattern.permute.xlu0 %v3255_v9  ;;  %v1447_v52 = vmax.f32 %v1446_v49, 1.0  ;;  %2447 = vmatprep.subr.mxu0 %v1599_v51  ;;  %v1631_v25 = vld [vmem:[#allocation10 + $0x1f8] sm:$0xff]  ;;  %v1630_v57 = vld [vmem:[#allocation10 + $0x1f0] sm:$0xff] }
 0x331   : > { %vm1441_vm6 = vcmp.lt.s32.totalorder %v1440_v50, 296  ;;  %v1583_v53 = vld [vmem:[#allocation10 + $0x78] sm:$0xff]  ;;  %2482 = vmatprep.subr.mxu1 %v1631_v25  ;;  %v1582_v58 = vld [vmem:[#allocation10 + $0x70] sm:$0xff]  ;;  %v1597_v60 = vld [vmem:[#allocation10 + $0xe8] sm:$0xff] }
 0x332   : > { %v1615_v54 = vld [vmem:[#allocation10 + $0x178] sm:$0xff]  ;;  %v1442_v55 = vsel %vm1441_vm6, %v1440_v50, 296  ;;  %2448 = vmatpush3.msra.mxu0 %v1583_v53  ;;  %1463 = vperm.xlu0 %2970, %v1447_v52   ;;  %v1614_v59 = vld [vmem:[#allocation10 + $0x170] sm:$0xff]  ;;  %v1629_v61 = vld [vmem:[#allocation10 + $0x1e8] sm:$0xff] }
 0x333   : > { %vm1443_vm7 = vcmp.gt.s32.totalorder %v1442_v55, 1  ;;  %2483 = vmatpush3.msra.mxu1 %v1615_v54  ;;  %2449 = vmatprep.subr.mxu0 %v1598_v56  ;;  %v1581_v63 = vld [vmem:[#allocation10 + $0x68] sm:$0xff]  ;;  %v1596_v2 = vld [vmem:[#allocation10 + $0xe0] sm:$0xff]  ;;  %v1595_v6 = vld [vmem:[#allocation10 + $0xd8] sm:$0xff] }
 0x334   : > { %v1444_v62 = vsel %vm1443_vm7, %v1442_v55, 1  ;;  %2484 = vmatprep.subr.mxu1 %v1630_v57  ;;  %2450 = vmatpush3.msra.mxu0 %v1582_v58  ;;  %v1613_v1 = vld [vmem:[#allocation10 + $0x168] sm:$0xff]  ;;  %v1628_v3 = vld [vmem:[#allocation10 + $0x1e0] sm:$0xff]  ;;  %v1627_v7 = vld [vmem:[#allocation10 + $0x1d8] sm:$0xff] }
 0x335   : > { %v1445_v0 = vcvt.s32.f32 %v1444_v62  ;;  %2485 = vmatpush3.msra.mxu1 %v1614_v59  ;;  %2451 = vmatprep.subr.mxu0 %v1597_v60  ;;  %v1580_v4 = vld [vmem:[#allocation10 + $0x60] sm:$0xff]  ;;  %v1579_v8 = vld [vmem:[#allocation10 + $0x58] sm:$0xff]  ;;  %v1594_v11 = vld [vmem:[#allocation10 + $0xd0] sm:$0xff] }
 0x336   : > { %2486 = vmatprep.subr.mxu1 %v1629_v61  ;;  %2452 = vmatpush3.msra.mxu0 %v1581_v63  ;;  %v1612_v5 = vld [vmem:[#allocation10 + $0x160] sm:$0xff]  ;;  %v1611_v10 = vld [vmem:[#allocation10 + $0x158] sm:$0xff]  ;;  %v1626_v12 = vld [vmem:[#allocation10 + $0x1d0] sm:$0xff]  ;;  %v1671_v63 = vsub.s32 1, %v3610_v38 }
 0x337   : > { %1451 = vperm.xlu0 %2970, %v1445_v0   ;;  %2487 = vmatpush3.msra.mxu1 %v1613_v1  ;;  %v1578_v13 = vld [vmem:[#allocation10 + $0x50] sm:$0xff]  ;;  %v1593_v15 = vld [vmem:[#allocation10 + $0xc8] sm:$0xff]  ;;  %v1592_v19 = vld [vmem:[#allocation10 + $0xc0] sm:$0xff]  ;;  %v1679_v0 = vsub.s32 3, %v3610_v38  ;;  %v1675_v1 = vsub.s32 2, %v3610_v38 }
 0x338   : > { %2453 = vmatprep.subr.mxu0 %v1596_v2  ;;  %2488 = vmatprep.subr.mxu1 %v1628_v3  ;;  %v1610_v14 = vld [vmem:[#allocation10 + $0x150] sm:$0xff]  ;;  %v1625_v16 = vld [vmem:[#allocation10 + $0x1c8] sm:$0xff]  ;;  %v1624_v20 = vld [vmem:[#allocation10 + $0x1c0] sm:$0xff] }
 0x339   : > { %2454 = vmatpush3.msra.mxu0 %v1580_v4  ;;  %2489 = vmatpush3.msra.mxu1 %v1612_v5  ;;  %v1577_v17 = vld [vmem:[#allocation10 + $0x48] sm:$0xff]  ;;  %v1576_v21 = vld [vmem:[#allocation10 + $0x40] sm:$0xff]  ;;  %v1591_v23 = vld [vmem:[#allocation10 + $0xb8] sm:$0xff]  ;;  %v1687_v5 = vsub.s32 5, %v3610_v38 }
 0x33a   : > { %2455 = vmatprep.subr.mxu0 %v1595_v6  ;;  %2490 = vmatprep.subr.mxu1 %v1627_v7  ;;  %v1609_v18 = vld [vmem:[#allocation10 + $0x148] sm:$0xff]  ;;  %v1608_v22 = vld [vmem:[#allocation10 + $0x140] sm:$0xff]  ;;  %v1623_v24 = vld [vmem:[#allocation10 + $0x1b8] sm:$0xff] }
 0x33b   : > { %2456 = vmatpush3.msra.mxu0 %v1579_v8  ;;  %2491 = vmatpush3.msra.mxu1 %v1611_v10  ;;  %v1575_v26 = vld [vmem:[#allocation10 + $0x38] sm:$0xff]  ;;  %v1590_v28 = vld [vmem:[#allocation10 + $0xb0] sm:$0xff]  ;;  %v1589_v32 = vld [vmem:[#allocation10 + $0xa8] sm:$0xff] }
 0x33c   : > { %2457 = vmatprep.subr.mxu0 %v1594_v11  ;;  %2492 = vmatprep.subr.mxu1 %v1626_v12  ;;  %v1607_v27 = vld [vmem:[#allocation10 + $0x138] sm:$0xff]  ;;  %v1622_v29 = vld [vmem:[#allocation10 + $0x1b0] sm:$0xff]  ;;  %v1621_v33 = vld [vmem:[#allocation10 + $0x1a8] sm:$0xff] }
 0x33d   : > { %2458 = vmatpush3.msra.mxu0 %v1578_v13  ;;  %2493 = vmatpush3.msra.mxu1 %v1610_v14  ;;  %v1574_v30 = vld [vmem:[#allocation10 + $0x30] sm:$0xff]  ;;  %v1573_v34 = vld [vmem:[#allocation10 + $0x28] sm:$0xff]  ;;  %v1588_v36 = vld [vmem:[#allocation10 + $0xa0] sm:$0xff] }
 0x33e   : > { %2459 = vmatprep.subr.mxu0 %v1593_v15  ;;  %2494 = vmatprep.subr.mxu1 %v1625_v16  ;;  %v1606_v31 = vld [vmem:[#allocation10 + $0x130] sm:$0xff]  ;;  %v1605_v35 = vld [vmem:[#allocation10 + $0x128] sm:$0xff]  ;;  %v1620_v37 = vld [vmem:[#allocation10 + $0x1a0] sm:$0xff] }
 0x33f   : > { %2460 = vmatpush3.msra.mxu0 %v1577_v17  ;;  %2495 = vmatpush3.msra.mxu1 %v1609_v18  ;;  %v1572_v39 = vld [vmem:[#allocation10 + $0x20] sm:$0xff]  ;;  %v1587_v42 = vld [vmem:[#allocation10 + $0x98] sm:$0xff]  ;;  %v1586_v46 = vld [vmem:[#allocation10 + $0x90] sm:$0xff] }
 0x340   : > { %2461 = vmatprep.subr.mxu0 %v1592_v19  ;;  %2496 = vmatprep.subr.mxu1 %v1624_v20  ;;  %v1604_v40 = vld [vmem:[#allocation10 + $0x120] sm:$0xff]  ;;  %v1619_v43 = vld [vmem:[#allocation10 + $0x198] sm:$0xff]  ;;  %v1618_v47 = vld [vmem:[#allocation10 + $0x190] sm:$0xff] }
 0x341   : > { %2462 = vmatpush3.msra.mxu0 %v1576_v21  ;;  %2497 = vmatpush3.msra.mxu1 %v1608_v22  ;;  %v1571_v44 = vld [vmem:[#allocation10 + $0x18] sm:$0xff]  ;;  %v1570_v48 = vld [vmem:[#allocation10 + $0x10] sm:$0xff]  ;;  %v1585_v50 = vld [vmem:[#allocation10 + $0x88] sm:$0xff] }
 0x342   : > { %2463 = vmatprep.subr.mxu0 %v1591_v23  ;;  %2498 = vmatprep.subr.mxu1 %v1623_v24  ;;  %v1603_v45 = vld [vmem:[#allocation10 + $0x118] sm:$0xff]  ;;  %v1602_v49 = vld [vmem:[#allocation10 + $0x110] sm:$0xff]  ;;  %v1617_v51 = vld [vmem:[#allocation10 + $0x188] sm:$0xff] }
 0x343   : > { %2464 = vmatpush3.msra.mxu0 %v1575_v26  ;;  %2499 = vmatpush3.msra.mxu1 %v1607_v27  ;;  %v1569_v9 = vld [vmem:[#allocation10 + $0x8] sm:$0xff]  ;;  %v1584_v25 = vld [vmem:[#allocation10 + $0x80] sm:$0xff]  ;;  %v1663_v56 = vld [vmem:[#allocation10 + $0x2f8] sm:$0xff] }
 0x344   : > { %2465 = vmatprep.subr.mxu0 %v1590_v28  ;;  %2500 = vmatprep.subr.mxu1 %v1622_v29  ;;  %v1601_v52 = vld [vmem:[#allocation10 + $0x108] sm:$0xff]  ;;  %v1616_v53 = vld [vmem:[#allocation10 + $0x180] sm:$0xff]  ;;  %v1503_v57 = vld [vmem:[#allocation9 + $0xf8] sm:$0xff] }
 0x345   : > { %2466 = vmatpush3.msra.mxu0 %v1574_v30  ;;  %2501 = vmatpush3.msra.mxu1 %v1606_v31  ;;  %v1568_v54 = vld [vmem:[#allocation10] sm:$0xff]  ;;  %v1460_v62 = vld [vmem:[#allocation3] sm:$0x3f]  ;;  %v1647_v12 = vld [vmem:[#allocation10 + $0x278] sm:$0xff] }
 0x346   : > { %2467 = vmatprep.subr.mxu0 %v1589_v32  ;;  %2502 = vmatprep.subr.mxu1 %v1621_v33  ;;  %v1600_v55 = vld [vmem:[#allocation10 + $0x100] sm:$0xff]  ;;  %v1487_v13 = vld [vmem:[#allocation9 + $0x78] sm:$0xff]  ;;  %v1662_v15 = vld [vmem:[#allocation10 + $0x2f0] sm:$0xff] }
 0x347   : > { %2468 = vmatpush3.msra.mxu0 %v1573_v34  ;;  %2503 = vmatpush3.msra.mxu1 %v1605_v35  ;;  %v1448_v4 = vld [vmem:[#allocation2] sm:$0x3f]  ;;  %v1502_v17 = vld [vmem:[#allocation9 + $0xf0] sm:$0xff]  ;;  %v1659_v30 = vld [vmem:[#allocation10 + $0x2d8] sm:$0xff] }
 0x348   : > { %2469 = vmatprep.subr.mxu0 %v1588_v36  ;;  %2504 = vmatprep.subr.mxu1 %v1620_v37  ;;  %v1646_v18 = vld [vmem:[#allocation10 + $0x270] sm:$0xff]  ;;  %v1661_v20 = vld [vmem:[#allocation10 + $0x2e8] sm:$0xff]  ;;  %v1660_v26 = vld [vmem:[#allocation10 + $0x2e0] sm:$0xff] }
 0x349   : > { %2470 = vmatpush3.msra.mxu0 %v1572_v39  ;;  %2505 = vmatpush3.msra.mxu1 %v1604_v40  ;;  %v1486_v19 = vld [vmem:[#allocation9 + $0x70] sm:$0xff]  ;;  %v1501_v22 = vld [vmem:[#allocation9 + $0xe8] sm:$0xff]  ;;  %v1500_v27 = vld [vmem:[#allocation9 + $0xe0] sm:$0xff] }
 0x34a   : > { %2471 = vmatprep.subr.mxu0 %v1587_v42  ;;  %2506 = vmatprep.subr.mxu1 %v1619_v43  ;;  %v1645_v23 = vld [vmem:[#allocation10 + $0x268] sm:$0xff]  ;;  %v1644_v28 = vld [vmem:[#allocation10 + $0x260] sm:$0xff]  ;;  %v1499_v31 = vld [vmem:[#allocation9 + $0xd8] sm:$0xff] }
 0x34b   : > { %2472 = vmatpush3.msra.mxu0 %v1571_v44  ;;  %2507 = vmatpush3.msra.mxu1 %v1603_v45  ;;  %v1485_v24 = vld [vmem:[#allocation9 + $0x68] sm:$0xff]  ;;  %v1484_v29 = vld [vmem:[#allocation9 + $0x60] sm:$0xff]  ;;  %v1643_v32 = vld [vmem:[#allocation10 + $0x258] sm:$0xff] }
 0x34c   : > { %2473 = vmatprep.subr.mxu0 %v1586_v46  ;;  %2508 = vmatprep.subr.mxu1 %v1618_v47  ;;  %v1483_v33 = vld [vmem:[#allocation9 + $0x58] sm:$0xff]  ;;  %v1658_v34 = vld [vmem:[#allocation10 + $0x2d0] sm:$0xff]  ;;  %v1657_v39 = vld [vmem:[#allocation10 + $0x2c8] sm:$0xff] }
 0x34d   : > { %2474 = vmatpush3.msra.mxu0 %v1570_v48  ;;  %2509 = vmatpush3.msra.mxu1 %v1602_v49  ;;  %v1498_v35 = vld [vmem:[#allocation9 + $0xd0] sm:$0xff]  ;;  %v1497_v40 = vld [vmem:[#allocation9 + $0xc8] sm:$0xff]  ;;  %v1656_v44 = vld [vmem:[#allocation10 + $0x2c0] sm:$0xff] }
 0x34e   : > { %2475 = vmatprep.subr.mxu0 %v1585_v50  ;;  %2510 = vmatprep.subr.mxu1 %v1617_v51  ;;  %v1642_v36 = vld [vmem:[#allocation10 + $0x250] sm:$0xff]  ;;  %v1641_v42 = vld [vmem:[#allocation10 + $0x248] sm:$0xff]  ;;  %v1496_v45 = vld [vmem:[#allocation9 + $0xc0] sm:$0xff] }
 0x34f   : > { %2476 = vmatpush3.msra.mxu0 %v1569_v9  ;;  %2511 = vmatpush3.msra.mxu1 %v1601_v52  ;;  %v1482_v37 = vld [vmem:[#allocation9 + $0x50] sm:$0xff]  ;;  %v1481_v43 = vld [vmem:[#allocation9 + $0x48] sm:$0xff]  ;;  %v1640_v46 = vld [vmem:[#allocation10 + $0x240] sm:$0xff] }
 0x350   : > { %2477 = vmatprep.subr.mxu0 %v1584_v25  ;;  %2512 = vmatprep.subr.mxu1 %v1616_v53  ;;  %v1480_v47 = vld [vmem:[#allocation9 + $0x40] sm:$0xff]  ;;  %v1655_v48 = vld [vmem:[#allocation10 + $0x2b8] sm:$0xff]  ;;  %v1654_v9 = vld [vmem:[#allocation10 + $0x2b0] sm:$0xff] }
 0x351   : > { %2478 = vmatpush3.msra.mxu0 %v1568_v54  ;;  %2513 = vmatpush3.msra.mxu1 %v1600_v55  ;;  %v1495_v49 = vld [vmem:[#allocation9 + $0xb8] sm:$0xff]  ;;  %v1494_v52 = vld [vmem:[#allocation9 + $0xb0] sm:$0xff]  ;;  %v1653_v54 = vld [vmem:[#allocation10 + $0x2a8] sm:$0xff] }
 0x352   : > { %2517 = vmatprep.subr.mxu0 %v1663_v56  ;;  %2552 = vmatprep.subr.mxu1 %v1503_v57  ;;  %v1639_v50 = vld [vmem:[#allocation10 + $0x238] sm:$0xff]  ;;  %v1638_v25 = vld [vmem:[#allocation10 + $0x230] sm:$0xff]  ;;  %v1493_v55 = vld [vmem:[#allocation9 + $0xa8] sm:$0xff] }
 0x353   : > { %v1479_v51 = vld [vmem:[#allocation9 + $0x38] sm:$0xff]  ;;  %v1478_v53 = vld [vmem:[#allocation9 + $0x30] sm:$0xff]  ;;  %v1637_v56 = vld [vmem:[#allocation10 + $0x228] sm:$0xff] }
 0x354   : > { %v1477_v57 = vld [vmem:[#allocation9 + $0x28] sm:$0xff] }
 0x3ad   : > { %v1464_v58 = vpop.permute.xlu0 %1463 }
 0x3ae   : > { %v1469_v59 = vrot.slane %v1464_v58, %v3614_v41  ;;  %v1652_v58 = vld [vmem:[#allocation10 + $0x2a0] sm:$0xff] }
 0x3b0   : > { %2971 = vrcp.f32 %v1469_v59  ;;  %v1492_v59 = vld [vmem:[#allocation9 + $0xa0] sm:$0xff] }
 0x3b2   : > { %v1452_v60 = vpop.permute.xlu0 %1451 }
 0x3b3   : > { %v1457_v61 = vrot.slane %v1452_v60, %v3614_v41  ;;  %v1636_v60 = vld [vmem:[#allocation10 + $0x220] sm:$0xff] }
 0x3b5   : > { %2973 = vrcp.f32 %v1457_v61  ;;  %v1476_v61 = vld [vmem:[#allocation9 + $0x20] sm:$0xff] }
 0x3bd   : > { %v2972_v2 = vpop.eup %2971 }
 0x3be   : > { %v3736_v3 = vmul.f32 %v2972_v2, %v1460_v62  ;;  %v1651_v62 = vld [vmem:[#allocation10 + $0x298] sm:$0xff] }
 0x3bf   : > { %v1635_v2 = vld [vmem:[#allocation10 + $0x218] sm:$0xff] }
 0x3c0   : > { %v1672_v6 = vrot.slane %v3736_v3, %v1671_v63  ;;  %v1680_v7 = vrot.slane %v3736_v3, %v1679_v0  ;;  %v1668_v8 = vrot.slane %v3736_v3, %v3614_v41  ;;  %v1676_v10 = vrot.slane %v3736_v3, %v1675_v1 }
 0x3c1   : > { %v1688_v16 = vrot.slane %v3736_v3, %v1687_v5 }
 0x3c2   : > { %v2974_v11 = vpop.eup %2973  ;;  %1759 = vmatprep.mubr.f32.mxu0 %v1672_v6  ;;  %1829 = vmatprep.mubr.f32.mxu1 %v1680_v7  ;;  %v1650_v6 = vld [vmem:[#allocation10 + $0x290] sm:$0xff] }
 0x3c3   : > { %v3748_v14 = vmul.f32 %v2974_v11, %v1448_v4  ;;  %1760 = vmatmul.mubr.f32.vlgmr.msra.gmra.mxu0 %v1668_v8  ;;  %1830 = vmatmul.mubr.f32.vlgmr.msra.gmra.mxu1 %v1676_v10  ;;  %v1475_v4 = vld [vmem:[#allocation9 + $0x18] sm:$0xff]  ;;  %v1490_v7 = vld [vmem:[#allocation9 + $0x90] sm:$0xff]  ;;  %v1649_v11 = vld [vmem:[#allocation10 + $0x288] sm:$0xff] }
 0x3c4   : > { %2518 = vmatpush3.msra.mxu0 %v1647_v12  ;;  %2553 = vmatpush3.msra.mxu1 %v1487_v13  ;;  %v1634_v8 = vld [vmem:[#allocation10 + $0x210] sm:$0xff]  ;;  %v1489_v12 = vld [vmem:[#allocation9 + $0x88] sm:$0xff] }
 0x3c5   : > { %v1913_v21 = vrot.slane %v3748_v14, %v1671_v63  ;;  %2519 = vmatprep.subr.mxu0 %v1662_v15  ;;  %1899 = vmatprep.mubr.f32.mxu0 %v1688_v16  ;;  %v1491_v63 = vld [vmem:[#allocation9 + $0x98] sm:$0xff]  ;;  %v1474_v10 = vld [vmem:[#allocation9 + $0x10] sm:$0xff]  ;;  %v1633_v13 = vld [vmem:[#allocation10 + $0x208] sm:$0xff]  ;;  %v1683_v16 = vsub.s32 4, %v3610_v38 }
 0x3c6   : > { %2554 = vmatprep.subr.mxu1 %v1502_v17  ;;  %2520 = vmatpush3.msra.mxu0 %v1646_v18  ;;  %v1473_v15 = vld [vmem:[#allocation9 + $0x8] sm:$0xff]  ;;  %v1648_v17 = vld [vmem:[#allocation10 + $0x280] sm:$0xff] }
 0x3c7   : > { %2555 = vmatpush3.msra.mxu1 %v1486_v19  ;;  %2521 = vmatprep.subr.mxu0 %v1661_v20  ;;  %v1488_v18 = vld [vmem:[#allocation9 + $0x80] sm:$0xff] }
 0x3c8   : > { %2556 = vmatprep.subr.mxu1 %v1501_v22  ;;  %2000 = vmatprep.mubr.f32.mxu1 %v1913_v21  ;;  %v1632_v19 = vld [vmem:[#allocation10 + $0x200] sm:$0xff]  ;;  %v1684_v21 = vrot.slane %v3736_v3, %v1683_v16  ;;  %v1909_v22 = vrot.slane %v3748_v14, %v3614_v41  ;;  %v1929_v3 = vrot.slane %v3748_v14, %v1687_v5  ;;  %v1566_v41 = vld [vmem:[#allocation9 + $0x2f0] sm:$0xff] }
 0x3c9   : > { %2522 = vmatpush3.msra.mxu0 %v1645_v23  ;;  %2557 = vmatpush3.msra.mxu1 %v1485_v24  ;;  %v1472_v20 = vld [vmem:[#allocation9] sm:$0xff]  ;;  %v1535_v23 = vld [vmem:[#allocation9 + $0x1f8] sm:$0xff] }
 0x3ca   : > { %2523 = vmatprep.subr.mxu0 %v1660_v26  ;;  %2558 = vmatprep.subr.mxu1 %v1500_v27  ;;  %v1567_v24 = vld [vmem:[#allocation9 + $0x2f8] sm:$0xff]  ;;  %v1921_v27 = vrot.slane %v3748_v14, %v1679_v0  ;;  %v1517_v0 = vld [vmem:[#allocation9 + $0x168] sm:$0xff]  ;;  %v1516_v5 = vld [vmem:[#allocation9 + $0x160] sm:$0xff] }
 0x3cb   : > { %2524 = vmatpush3.msra.mxu0 %v1644_v28  ;;  %2559 = vmatpush3.msra.mxu1 %v1484_v29  ;;  %v1519_v26 = vld [vmem:[#allocation9 + $0x178] sm:$0xff]  ;;  %v1534_v29 = vld [vmem:[#allocation9 + $0x1f0] sm:$0xff] }
 0x3cc   : > { %2525 = vmatprep.subr.mxu0 %v1659_v30  ;;  %2560 = vmatprep.subr.mxu1 %v1499_v31  ;;  %v1551_v28 = vld [vmem:[#allocation9 + $0x278] sm:$0xff]  ;;  %v1518_v30 = vld [vmem:[#allocation9 + $0x170] sm:$0xff] }
 0x3cd   : > { %2526 = vmatpush3.msra.mxu0 %v1643_v32  ;;  %2561 = vmatpush3.msra.mxu1 %v1483_v33  ;;  %v1550_v31 = vld [vmem:[#allocation9 + $0x270] sm:$0xff]  ;;  %v1533_v32 = vld [vmem:[#allocation9 + $0x1e8] sm:$0xff] }
 0x3ce   : > { %2527 = vmatprep.subr.mxu0 %v1658_v34  ;;  %2562 = vmatprep.subr.mxu1 %v1498_v35  ;;  %v1565_v33 = vld [vmem:[#allocation9 + $0x2e8] sm:$0xff]  ;;  %v1532_v35 = vld [vmem:[#allocation9 + $0x1e0] sm:$0xff] }
 0x3cf   : > { %2528 = vmatpush3.msra.mxu0 %v1642_v36  ;;  %2563 = vmatpush3.msra.mxu1 %v1482_v37  ;;  %v1549_v34 = vld [vmem:[#allocation9 + $0x268] sm:$0xff]  ;;  %v1564_v36 = vld [vmem:[#allocation9 + $0x2e0] sm:$0xff] }
 0x3d0   : > { %2529 = vmatprep.subr.mxu0 %v1657_v39  ;;  %2564 = vmatprep.subr.mxu1 %v1497_v40  ;;  %v1548_v37 = vld [vmem:[#allocation9 + $0x260] sm:$0xff]  ;;  %v1531_v39 = vld [vmem:[#allocation9 + $0x1d8] sm:$0xff] }
 0x3d1   : > { %2530 = vmatpush3.msra.mxu0 %v1641_v42  ;;  %2565 = vmatpush3.msra.mxu1 %v1481_v43  ;;  %v1563_v40 = vld [vmem:[#allocation9 + $0x2d8] sm:$0xff] }
 0x3d2   : > { %2531 = vmatprep.subr.mxu0 %v1656_v44  ;;  %2566 = vmatprep.subr.mxu1 %v1496_v45  ;;  %v1515_v42 = vld [vmem:[#allocation9 + $0x158] sm:$0xff]  ;;  %v1530_v44 = vld [vmem:[#allocation9 + $0x1d0] sm:$0xff] }
 0x3d3   : > { %2532 = vmatpush3.msra.mxu0 %v1640_v46  ;;  %2567 = vmatpush3.msra.mxu1 %v1480_v47  ;;  %v1547_v43 = vld [vmem:[#allocation9 + $0x258] sm:$0xff]  ;;  %v1562_v45 = vld [vmem:[#allocation9 + $0x2d0] sm:$0xff] }
 0x3d4   : > { %2533 = vmatprep.subr.mxu0 %v1655_v48  ;;  %2568 = vmatprep.subr.mxu1 %v1495_v49  ;;  %v1514_v46 = vld [vmem:[#allocation9 + $0x150] sm:$0xff]  ;;  %v1529_v48 = vld [vmem:[#allocation9 + $0x1c8] sm:$0xff] }
 0x3d5   : > { %2534 = vmatpush3.msra.mxu0 %v1639_v50  ;;  %2569 = vmatpush3.msra.mxu1 %v1479_v51  ;;  %v1546_v47 = vld [vmem:[#allocation9 + $0x250] sm:$0xff]  ;;  %v1561_v49 = vld [vmem:[#allocation9 + $0x2c8] sm:$0xff] }
 0x3d6   : > { %2535 = vmatprep.subr.mxu0 %v1654_v9  ;;  %2570 = vmatprep.subr.mxu1 %v1494_v52  ;;  %v1513_v50 = vld [vmem:[#allocation9 + $0x148] sm:$0xff]  ;;  %v1528_v9 = vld [vmem:[#allocation9 + $0x1c0] sm:$0xff] }
 0x3d7   : > { %2536 = vmatpush3.msra.mxu0 %v1638_v25  ;;  %2571 = vmatpush3.msra.mxu1 %v1478_v53  ;;  %v1545_v51 = vld [vmem:[#allocation9 + $0x248] sm:$0xff]  ;;  %v1560_v52 = vld [vmem:[#allocation9 + $0x2c0] sm:$0xff] }
 0x3d8   : > { %2537 = vmatprep.subr.mxu0 %v1653_v54  ;;  %2572 = vmatprep.subr.mxu1 %v1493_v55  ;;  %v1512_v25 = vld [vmem:[#allocation9 + $0x140] sm:$0xff]  ;;  %v1527_v54 = vld [vmem:[#allocation9 + $0x1b8] sm:$0xff] }
 0x3d9   : > { %2538 = vmatpush3.msra.mxu0 %v1637_v56  ;;  %2573 = vmatpush3.msra.mxu1 %v1477_v57  ;;  %v1544_v53 = vld [vmem:[#allocation9 + $0x240] sm:$0xff]  ;;  %v1559_v55 = vld [vmem:[#allocation9 + $0x2b8] sm:$0xff] }
 0x3da   : > { %2539 = vmatprep.subr.mxu0 %v1652_v58  ;;  %2574 = vmatprep.subr.mxu1 %v1492_v59  ;;  %v1511_v56 = vld [vmem:[#allocation9 + $0x138] sm:$0xff]  ;;  %v1526_v58 = vld [vmem:[#allocation9 + $0x1b0] sm:$0xff] }
 0x3db   : > { %2540 = vmatpush3.msra.mxu0 %v1636_v60  ;;  %2575 = vmatpush3.msra.mxu1 %v1476_v61  ;;  %v1543_v57 = vld [vmem:[#allocation9 + $0x238] sm:$0xff]  ;;  %v1558_v59 = vld [vmem:[#allocation9 + $0x2b0] sm:$0xff] }
 0x3dc   : > { %2541 = vmatprep.subr.mxu0 %v1651_v62  ;;  %2576 = vmatprep.subr.mxu1 %v1491_v63  ;;  %v1510_v60 = vld [vmem:[#allocation9 + $0x130] sm:$0xff]  ;;  %v1525_v62 = vld [vmem:[#allocation9 + $0x1a8] sm:$0xff] }
 0x3dd   : > { %2542 = vmatpush3.msra.mxu0 %v1635_v2  ;;  %2577 = vmatpush3.msra.mxu1 %v1475_v4  ;;  %v1542_v61 = vld [vmem:[#allocation9 + $0x230] sm:$0xff]  ;;  %v1557_v63 = vld [vmem:[#allocation9 + $0x2a8] sm:$0xff] }
 0x3de   : > { %2543 = vmatprep.subr.mxu0 %v1650_v6  ;;  %2578 = vmatprep.subr.mxu1 %v1490_v7  ;;  %v1509_v2 = vld [vmem:[#allocation9 + $0x128] sm:$0xff]  ;;  %v1524_v6 = vld [vmem:[#allocation9 + $0x1a0] sm:$0xff] }
 0x3df   : > { %2544 = vmatpush3.msra.mxu0 %v1634_v8  ;;  %2579 = vmatpush3.msra.mxu1 %v1474_v10  ;;  %v1541_v4 = vld [vmem:[#allocation9 + $0x228] sm:$0xff]  ;;  %v1556_v7 = vld [vmem:[#allocation9 + $0x2a0] sm:$0xff] }
 0x3e0   : > { %2545 = vmatprep.subr.mxu0 %v1649_v11  ;;  %2580 = vmatprep.subr.mxu1 %v1489_v12  ;;  %v1508_v8 = vld [vmem:[#allocation9 + $0x120] sm:$0xff]  ;;  %v1523_v11 = vld [vmem:[#allocation9 + $0x198] sm:$0xff] }
 0x3e1   : > { %2546 = vmatpush3.msra.mxu0 %v1633_v13  ;;  %2581 = vmatpush3.msra.mxu1 %v1473_v15  ;;  %v1540_v10 = vld [vmem:[#allocation9 + $0x220] sm:$0xff]  ;;  %v1555_v12 = vld [vmem:[#allocation9 + $0x298] sm:$0xff] }
 0x3e2   : > { %2547 = vmatprep.subr.mxu0 %v1648_v17  ;;  %2582 = vmatprep.subr.mxu1 %v1488_v18  ;;  %v1507_v13 = vld [vmem:[#allocation9 + $0x118] sm:$0xff]  ;;  %v1522_v17 = vld [vmem:[#allocation9 + $0x190] sm:$0xff] }
 0x3e3   : > { %2548 = vmatpush3.msra.mxu0 %v1632_v19  ;;  %2583 = vmatpush3.msra.mxu1 %v1472_v20  ;;  %v1539_v15 = vld [vmem:[#allocation9 + $0x218] sm:$0xff]  ;;  %v1554_v18 = vld [vmem:[#allocation9 + $0x290] sm:$0xff] }
 0x3e4   : > { %1900 = vmatmul.mubr.f32.vlgmr.msra.gmra.mxu0 %v1684_v21  ;;  %2001 = vmatmul.mubr.f32.vlgmr.msra.gmra.mxu1 %v1909_v22  ;;  %v1506_v19 = vld [vmem:[#allocation9 + $0x110] sm:$0xff]  ;;  %v1521_v21 = vld [vmem:[#allocation9 + $0x188] sm:$0xff] }
 0x3e5   : > { %2587 = vmatprep.subr.mxu0 %v1535_v23  ;;  %2622 = vmatprep.subr.mxu1 %v1567_v24  ;;  %v1538_v20 = vld [vmem:[#allocation9 + $0x210] sm:$0xff]  ;;  %v1553_v22 = vld [vmem:[#allocation9 + $0x288] sm:$0xff] }
 0x3e6   : > { %2588 = vmatpush3.msra.mxu0 %v1519_v26  ;;  %2070 = vmatprep.mubr.f32.mxu0 %v1921_v27  ;;  %v1505_v23 = vld [vmem:[#allocation9 + $0x108] sm:$0xff]  ;;  %v1520_v26 = vld [vmem:[#allocation9 + $0x180] sm:$0xff] }
 0x3e7   : > { %2623 = vmatpush3.msra.mxu1 %v1551_v28  ;;  %2140 = vmatprep.mubr.f32.mxu1 %v1929_v3  ;;  %v1537_v24 = vld [vmem:[#allocation9 + $0x208] sm:$0xff]  ;;  %v1552_v27 = vld [vmem:[#allocation9 + $0x280] sm:$0xff] }
 0x3e8   : > { %2589 = vmatprep.subr.mxu0 %v1534_v29  ;;  %2624 = vmatprep.subr.mxu1 %v1566_v41  ;;  %v1504_v28 = vld [vmem:[#allocation9 + $0x100] sm:$0xff]  ;;  %v1917_v29 = vrot.slane %v3748_v14, %v1675_v1  ;;  %v1925_v41 = vrot.slane %v3748_v14, %v1683_v16 }
 0x3e9   : > { %2590 = vmatpush3.msra.mxu0 %v1518_v30  ;;  %2625 = vmatpush3.msra.mxu1 %v1550_v31  ;;  %v1536_v3 = vld [vmem:[#allocation9 + $0x200] sm:$0xff] }
 0x3ea   : > { %2591 = vmatprep.subr.mxu0 %v1533_v32  ;;  %2626 = vmatprep.subr.mxu1 %v1565_v33 }
 0x3eb   : > { %2592 = vmatpush3.msra.mxu0 %v1517_v0  ;;  %2627 = vmatpush3.msra.mxu1 %v1549_v34 }
 0x3ec   : > { %2593 = vmatprep.subr.mxu0 %v1532_v35  ;;  %2628 = vmatprep.subr.mxu1 %v1564_v36 }
 0x3ed   : > { %2594 = vmatpush3.msra.mxu0 %v1516_v5  ;;  %2629 = vmatpush3.msra.mxu1 %v1548_v37 }
 0x3ee   : > { %2595 = vmatprep.subr.mxu0 %v1531_v39  ;;  %2630 = vmatprep.subr.mxu1 %v1563_v40 }
 0x3ef   : > { %2596 = vmatpush3.msra.mxu0 %v1515_v42  ;;  %2631 = vmatpush3.msra.mxu1 %v1547_v43 }
 0x3f0   : > { %2597 = vmatprep.subr.mxu0 %v1530_v44  ;;  %2632 = vmatprep.subr.mxu1 %v1562_v45 }
 0x3f1   : > { %2598 = vmatpush3.msra.mxu0 %v1514_v46  ;;  %2633 = vmatpush3.msra.mxu1 %v1546_v47 }
 0x3f2   : > { %2599 = vmatprep.subr.mxu0 %v1529_v48  ;;  %2634 = vmatprep.subr.mxu1 %v1561_v49 }
 0x3f3   : > { %2600 = vmatpush3.msra.mxu0 %v1513_v50  ;;  %2635 = vmatpush3.msra.mxu1 %v1545_v51 }
 0x3f4   : > { %2601 = vmatprep.subr.mxu0 %v1528_v9  ;;  %2636 = vmatprep.subr.mxu1 %v1560_v52 }
 0x3f5   : > { %2602 = vmatpush3.msra.mxu0 %v1512_v25  ;;  %2637 = vmatpush3.msra.mxu1 %v1544_v53 }
 0x3f6   : > { %2603 = vmatprep.subr.mxu0 %v1527_v54  ;;  %2638 = vmatprep.subr.mxu1 %v1559_v55 }
 0x3f7   : > { %2604 = vmatpush3.msra.mxu0 %v1511_v56  ;;  %2639 = vmatpush3.msra.mxu1 %v1543_v57 }
 0x3f8   : > { %2605 = vmatprep.subr.mxu0 %v1526_v58  ;;  %2640 = vmatprep.subr.mxu1 %v1558_v59 }
 0x3f9   : > { %2606 = vmatpush3.msra.mxu0 %v1510_v60  ;;  %2641 = vmatpush3.msra.mxu1 %v1542_v61 }
 0x3fa   : > { %2607 = vmatprep.subr.mxu0 %v1525_v62  ;;  %2642 = vmatprep.subr.mxu1 %v1557_v63 }
 0x3fb   : > { %2608 = vmatpush3.msra.mxu0 %v1509_v2  ;;  %2643 = vmatpush3.msra.mxu1 %v1541_v4 }
 0x3fc   : > { %2609 = vmatprep.subr.mxu0 %v1524_v6  ;;  %2644 = vmatprep.subr.mxu1 %v1556_v7 }
 0x3fd   : > { %2610 = vmatpush3.msra.mxu0 %v1508_v8  ;;  %2645 = vmatpush3.msra.mxu1 %v1540_v10 }
 0x3fe   : > { %2611 = vmatprep.subr.mxu0 %v1523_v11  ;;  %2646 = vmatprep.subr.mxu1 %v1555_v12 }
 0x3ff   : > { %2612 = vmatpush3.msra.mxu0 %v1507_v13  ;;  %2647 = vmatpush3.msra.mxu1 %v1539_v15 }
 0x400   : > { %2613 = vmatprep.subr.mxu0 %v1522_v17  ;;  %2648 = vmatprep.subr.mxu1 %v1554_v18 }
 0x401   : > { %2614 = vmatpush3.msra.mxu0 %v1506_v19  ;;  %2649 = vmatpush3.msra.mxu1 %v1538_v20 }
 0x402   : > { %2615 = vmatprep.subr.mxu0 %v1521_v21  ;;  %2650 = vmatprep.subr.mxu1 %v1553_v22 }
 0x403   : > { %2616 = vmatpush3.msra.mxu0 %v1505_v23  ;;  %2651 = vmatpush3.msra.mxu1 %v1537_v24 }
 0x404   : > { %2617 = vmatprep.subr.mxu0 %v1520_v26  ;;  %2652 = vmatprep.subr.mxu1 %v1552_v27 }
 0x405   : > { %2618 = vmatpush3.msra.mxu0 %v1504_v28  ;;  %2653 = vmatpush3.msra.mxu1 %v1536_v3 }
 0x406   : > { %2071 = vmatmul.mubr.f32.vlgmr.msra.gmra.mxu0 %v1917_v29  ;;  %2141 = vmatmul.mubr.f32.vlgmr.msra.gmra.mxu1 %v1925_v41 }
 0x483   : > { %v2479_v30 = vpop.f32.mrf.mxu0  ;;  %v2514_v31 = vpop.f32.mrf.mxu1 }
 0x485   : > { %v2480_v32 = vpop.f32.mrf.mxu0  ;;  %v2515_v0 = vpop.f32.mrf.mxu1 }
 0x486   : > { %v2481_v35 = vadd.f32 %v2480_v32, %v2479_v30  ;;  %v2516_v36 = vadd.f32 %v2515_v0, %v2514_v31 }
 0x488   : > { %v1832_v1 = vadd.f32 %v2516_v36, %v2481_v35 }
 0x4a4   : > { %v2549_v33 = vpop.f32.mrf.mxu0  ;;  %v2584_v5 = vpop.f32.mrf.mxu1 }
 0x4a6   : > { %v2550_v34 = vpop.f32.mrf.mxu0  ;;  %v2585_v39 = vpop.f32.mrf.mxu1 }
 0x4a7   : > { %v2551_v37 = vadd.f32 %v2550_v34, %v2549_v33  ;;  %v2586_v16 = vadd.f32 %v2585_v39, %v2584_v5 }
 0x4a9   : > { %v1902_v38 = vadd.f32 %v2551_v37, %v1832_v1 }
 0x4ab   : > { %v2003_v44 = vadd.f32 %v2586_v16, %v1902_v38 }
 0x4c6   : > { %v2619_v40 = vpop.f32.mrf.mxu0  ;;  %v2654_v14 = vpop.f32.mrf.mxu1 }
 0x4c8   : > { %v2620_v42 = vpop.f32.mrf.mxu0  ;;  %v2655_v43 = vpop.f32.mrf.mxu1 }
 0x4c9   : > { %v2621_v45 = vadd.f32 %v2620_v42, %v2619_v40  ;;  %v2656_v47 = vadd.f32 %v2655_v43, %v2654_v14 }
 0x4cb   : > { %v2073_v46 = vadd.f32 %v2621_v45, %v2003_v44 }
 0x4cd   : > { %v2143_v48 = vadd.f32 %v2656_v47, %v2073_v46 }
 0x4cf   : > { %2146 = vst [vmem:[%s3568_s9] sm:$0x1] %v2143_v48 }
 0x4d0 PF: > { %s3912_s18 = sld [smem:[#allocation21_spill]]  ;;  %s2160_s20 = sshll.u32 %s3568_s9, 4  ;;  %s2161_s20 = int_to_ptr.vmem [resolvable:$true] %s2160_s20 }
 0x4d1   : > { %s3913_s2 = sld [smem:[#allocation23_spill]]  ;;  %s2148_s0 = scalar_lea.sflag [#allocation6], %s448_s19 }
 0x4d2   : > { %s3914_s6 = sld [smem:[#allocation34_spill]]  ;;  %s3083_s24 = scalar_lea.vmem %s2161_s20, 16 }
 0x4d3   : > { %p3084_p11 = scmp.ne.s32.totalorder %s2161_s20, %s3083_s24  ;;  %s3256_s30 = smov [#allocation12]  }
 0x4d4   : > { %s3087_s12 = sshll.u32 %s3256_s30, 4  ;;  %s3088_s12 = int_to_ptr.vmem [resolvable:$false] %s3087_s12 }
 0x4d5   : > { %s3089_s1 = scalar_lea.vmem %s3088_s12, 32  ;;  %p3090_p13 = scmp.lt.s32.totalorder %s2161_s20, %s3088_s12 }
 0x4d6   : > { %s2444_s5 = sshll.u32 %s3912_s18, 4  ;;  %p3091_p5 = scmp.lt.s32.totalorder %s3089_s1, %s3083_s24 }
 0x4d7   : > { %p3915_p1 = scmp.ne.s32.totalorder %s3913_s2, 0 }
 0x4d8   : > { %s2158_s11 = scalar_lea.hbm %s3914_s6, %s2444_s5  ;;  %p3092_p12 = por %p3091_p5, %p3090_p13 }
 0x4d9   : > { %p3085_p8 = pnand %p3084_p11, %p3915_p1 }
 0x4db   : > { %p3086_p10 = pneg %p3085_p8 }
 0x4dd   : > { %p3093_p3 = pnand %p3092_p12, %p3086_p10 }
 0x4df   : > { %3096 = shalt.err (!%p3093_p3)
}
 0x4e0   : > { %s3097_s22 = scalar_lea.hbm %s2158_s11, 16  ;;  %s3101_s23 = scalar_lea.hbm %s3914_s6, 32 }
 0x4e1   : > { %p3098_p9 = scmp.ne.s32.totalorder %s2158_s11, %s3097_s22  ;;  %p3102_p2 = scmp.lt.s32.totalorder %s2158_s11, %s3914_s6 }
 0x4e2   : > { %p3103_p0 = scmp.lt.s32.totalorder %s3101_s23, %s3097_s22 }
 0x4e3   : > { %p3099_p6 = pnand %p3098_p9, %p3915_p1 }
 0x4e4   : > { %p3104_p7 = por %p3103_p0, %p3102_p2 }
 0x4e5   : > { %p3100_p4 = pneg %p3099_p6 }
 0x4e7   : > { %p3105_p11 = pnand %p3104_p7, %p3100_p4 }
 0x4e9   : > { %3108 = shalt.err (!%p3105_p11)
}
 0x4ea   : > { %2677 = dma.vmem_to_hbm [thread:$0]  (%p3915_p1), %s2161_s20, 16, %s2158_s11, %s2148_s0  }
 0x4eb PF: > { %s3916_s21 = sld [smem:[#allocation18_spill]]  ;;  %p2703_p8 = scmp.ge.s32.totalorder %s3240_s14, 2 }
 0x4ec   : > { %s3917_s17 = sld [smem:[#allocation24_spill]] }
 0x4f1   : > { %s2172_s18 = sand.u32 1, %s3916_s21  }
 0x4f2   : > { %p3918_p10 = scmp.ne.s32.totalorder %s3917_s17, 0  ;;  %s2173_s5 = scalar_lea.sflag [#allocation6], %s2172_s18 }
 0x4f4   : > { %p2694_p13 = pnand %p2703_p8, %p3918_p10 }
 0x4f6   : > { %p2695_p5 = pneg %p2694_p13 }
 0x4f8   : > { %3182 = dma.done.wait (%p2695_p5), %s2173_s5, 16  }
 0x4f9   : > { %3184 = vsyncadd (%p2695_p5), %s2173_s5, 4294967280  ;;  %s27_s14 = sadd.s32 1, %s3240_s14   ;;  %s3920_s2 = sld [smem:[#allocation27_spill]] }
 0x4fa   : > { %p3797_p12 = scmp.ge.s32.totalorder %s27_s14, 8   ;;  %s3921_s10 = sld [smem:[#allocation19_spill]] }
 0x4fb   : > { %s3922_s9 = sld [smem:[#allocation28_spill]]  ;;  %s3926_s24 = smov %s3192_s25 }
 0x4fc   : > { %s3923_s11 = sld [smem:[#allocation22_spill]]  ;;  %s3927_s25 = smov %s3196_s26 }
 0x4fd   : > { %s3924_s12 = sld [smem:[#allocation25_spill]]  ;;  %s3929_s27 = smov %s3204_s28 }
 0x4fe   : > { %s3925_s20 = sld [smem:[#allocation26_spill]]  ;;  %s3930_s28 = smov %s3208_s29 }
 0x4ff   : > { %s3928_s26 = smov %s3920_s2  ;;  %s3931_s29 = smov %s3496_s7 }
 0x500   : > { %s3932_s30 = smov %s3216_s8  ;;  %s3933_s8 = smov %s3921_s10 }
 0x501   :  { %26 = sbr.rel (!%p3797_p12) target bundleno = 20 (0x14), region = 135 }
 0x502   : > { %s3934_s10 = smov %s3923_s11  ;;  %s3935_s11 = smov %s3236_s13 }
 0x504   : > { %s3936_s13 = smov %s3925_s20 }
 0x506   :  { %2177 = vsyncpa [#allocation5], 1 }
 0x507   :  { %2179 = vsyncpa [#allocation5 + $0x1], 1 }
 0x508   :  { %2180 = vsyncpa [#allocation8], 1 }
 0x509   :  { %2182 = vsyncpa [#allocation8 + $0x1], 1 }
 0x50a   :  { %2183 = vsyncpa [#allocation11], 1 }
 0x50b   :  { %2184 = vsyncpa [#allocation6], 1 }
 0x50c   :  { %2186 = vsyncpa [#allocation6 + $0x1], 1 }

</bundles_post_ra>
